<compile_context>
chip_gen: v7x
topology: tpu7x:2x2x1
jax: 0.10.0
libtpu: 0.0.40
codegen_flags: <defaults>
</compile_context>

<pallas_src>
import math

import jax
import jax.numpy as jnp
from jax.experimental import pallas as pl
from jax.experimental.pallas import tpu as pltpu

# ---------------- problem sizes (small, consistent with the module) ----------
B = 4            # batch
S = 8            # sequence length
H = 32           # hidden size
N_HEADS = 4
HEAD_DIM = H // N_HEADS
N_EXPERTS = 2
G = B * N_HEADS  # fused (batch, head) dimension
SCALE = 1.0 / math.sqrt(HEAD_DIM)


# --------------------------- fused MoE-MHA kernel ----------------------------
def moe_mha_kernel(x_ref, mask_ref,
                   wq_ref, bq_ref, wk_ref, bk_ref, wv_ref, bv_ref,
                   wo_ref, bo_ref, out_ref):
    """One fused MoE multi-head self-attention step over the whole batch.

    Shapes (g = b * N_HEADS + n is the fused batch*head index):
      x_ref   : (B, S, H)
      mask_ref: (G, 1, S)          additive mask over key positions
      wq/wk/wv: (G, H, HEAD_DIM)   routed per-(batch,head) projection weights
      bq/bk/bv: (G, 1, HEAD_DIM)
      wo_ref  : (G, HEAD_DIM, H)   routed per-(batch,head) slice of out-proj
      bo_ref  : (B, 1, H)
      out_ref : (B, S, H)
    """
    x = x_ref[...].astype(jnp.float32)                          # (B, S, H)
    # Replicate each batch row once per head along the untiled leading dim.
    x_g = jnp.broadcast_to(x[:, None], (B, N_HEADS, S, H)).reshape(G, S, H)

    # Head-batched QKV projections (canonical batched matmuls on the MXU).
    q = jnp.einsum("gsh,ghd->gsd", x_g, wq_ref[...],
                   preferred_element_type=jnp.float32) + bq_ref[...]
    k = jnp.einsum("gsh,ghd->gsd", x_g, wk_ref[...],
                   preferred_element_type=jnp.float32) + bk_ref[...]
    v = jnp.einsum("gsh,ghd->gsd", x_g, wv_ref[...],
                   preferred_element_type=jnp.float32) + bv_ref[...]

    # Scaled dot-product attention, all (batch, head) pairs at once.
    s = jnp.einsum("gqd,gkd->gqk", q, k,
                   preferred_element_type=jnp.float32) * SCALE   # (G, S, S)
    s = s + mask_ref[...]                       # (G, 1, S) broadcast over queries
    s = s - jnp.max(s, axis=-1, keepdims=True)
    p = jnp.exp(s)
    # NOTE: pl.reciprocal(..., approx=True) would move the divide to the idle
    # EUP; kept exact so the result stays well within the 1e-4 validation
    # tolerance.  Flip to approx=True if the tolerance budget allows.
    p = p * pl.reciprocal(jnp.sum(p, axis=-1, keepdims=True), approx=False)

    ctx = jnp.einsum("gqk,gkd->gqd", p, v,
                     preferred_element_type=jnp.float32)         # (G, S, HEAD_DIM)

    # Output projection: per-head partial products, then sum over heads
    # (leading-dim adds only; avoids a head-merge transpose of the lane dim).
    o_h = jnp.einsum("gsd,gdo->gso", ctx, wo_ref[...],
                     preferred_element_type=jnp.float32)         # (G, S, H)
    o4 = o_h.reshape(B, N_HEADS, S, H)
    out = o4[:, 0]
    for n in range(1, N_HEADS):                 # statically unrolled, N_HEADS=4
        out = out + o4[:, n]
    out = out + bo_ref[...]
    out_ref[...] = out.astype(out_ref.dtype)


# ------------------------------- wrapper --------------------------------------
def expert_attention(hidden_states, attention_mask, routing_states, centers, params):
    """Pallas implementation of ExpertAttention.forward (single fused kernel)."""
    wq, bq, wk, bk, wv, bv, wo, bo = params

    # ---- routing: plain JAX (a few hundred FLOPs; cheaper than a kernel launch)
    h = routing_states.mean(axis=1)                                      # (B, H)
    d2 = jnp.sum((h[:, None, :] - centers[None, :, :]) ** 2, axis=-1)    # (B, E)
    eid = jnp.argmin(d2, axis=1)           # ties -> lowest index, like torch.min

    # ---- static per-head weight layout + routed gather (layout plumbing) ------
    wq_h = wq.reshape(N_EXPERTS, H, N_HEADS, HEAD_DIM).transpose(0, 2, 1, 3)
    wk_h = wk.reshape(N_EXPERTS, H, N_HEADS, HEAD_DIM).transpose(0, 2, 1, 3)
    wv_h = wv.reshape(N_EXPERTS, H, N_HEADS, HEAD_DIM).transpose(0, 2, 1, 3)
    wo_h = wo.reshape(N_EXPERTS, N_HEADS, HEAD_DIM, H)
    bq_h = bq.reshape(N_EXPERTS, N_HEADS, HEAD_DIM)
    bk_h = bk.reshape(N_EXPERTS, N_HEADS, HEAD_DIM)
    bv_h = bv.reshape(N_EXPERTS, N_HEADS, HEAD_DIM)

    wq_g = wq_h[eid].reshape(G, H, HEAD_DIM)        # (G, H, HEAD_DIM)
    wk_g = wk_h[eid].reshape(G, H, HEAD_DIM)
    wv_g = wv_h[eid].reshape(G, H, HEAD_DIM)
    wo_g = wo_h[eid].reshape(G, HEAD_DIM, H)        # (G, HEAD_DIM, H)
    bq_g = bq_h[eid].reshape(G, HEAD_DIM)[:, None, :]
    bk_g = bk_h[eid].reshape(G, HEAD_DIM)[:, None, :]
    bv_g = bv_h[eid].reshape(G, HEAD_DIM)[:, None, :]
    bo_b = bo[eid][:, None, :]                      # (B, 1, H)

    # Additive mask broadcast to the fused (batch, head) dim: (G, 1, S).
    mask_g = jnp.repeat(attention_mask, N_HEADS, axis=0)[:, None, :]

    out = pl.pallas_call(
        moe_mha_kernel,
        out_shape=jax.ShapeDtypeStruct((B, S, H), hidden_states.dtype),
        compiler_params=pltpu.CompilerParams(vmem_limit_bytes=16 * 1024 * 1024),
    )(hidden_states, mask_g,
      wq_g, bq_g, wk_g, bk_g, wv_g, bv_g, wo_g, bo_b)
    return out, eid


expert_attention_jit = jax.jit(expert_attention)


# ------------------------------ pure-JAX reference ---------------------------
def reference(hidden_states, attention_mask, routing_states, centers, params):
    wq, bq, wk, bk, wv, bv, wo, bo = params
    h = routing_states.mean(axis=1)
    d = jnp.sqrt(jnp.sum((h[:, None, :] - centers[None]) ** 2, axis=-1))
    eid = jnp.argmin(d, axis=1)

    def one(b):
        e = eid[b]
        x = hidden_states[b]
        q = x @ wq[e] + bq[e]
        k = x @ wk[e] + bk[e]
        v = x @ wv[e] + bv[e]
        qh = q.reshape(S, N_HEADS, HEAD_DIM).transpose(1, 0, 2)
        kh = k.reshape(S, N_HEADS, HEAD_DIM).transpose(1, 0, 2)
        vh = v.reshape(S, N_HEADS, HEAD_DIM).transpose(1, 0, 2)
        s = jnp.einsum("hqd,hkd->hqk", qh, kh) / math.sqrt(HEAD_DIM)
        s = s + attention_mask[b][None, None, :]
        p = jax.nn.softmax(s, axis=-1)
        ctx = jnp.einsum("hqk,hkd->hqd", p, vh).transpose(1, 0, 2).reshape(S, H)
        return ctx @ wo[e] + bo[e]

    return jnp.stack([one(b) for b in range(B)], axis=0), eid


# ------------------------------------ main ------------------------------------
if __name__ == "__main__":
    key = jax.random.PRNGKey(0)
    ks = jax.random.split(key, 16)

    hidden_states = jax.random.normal(ks[0], (B, S, H), jnp.float32)
    routing_states = jax.random.normal(ks[1], (B, S, H), jnp.float32)
    centers = jax.random.normal(ks[2], (N_EXPERTS, H), jnp.float32)

    # binary padding mask -> additive mask (BERT-style)
    mask_bin = (jax.random.uniform(ks[3], (B, S)) > 0.2).astype(jnp.float32)
    attention_mask = (1.0 - mask_bin) * -1e9

    init = lambda k, shape: 0.05 * jax.random.normal(k, shape, jnp.float32)
    wq = init(ks[4], (N_EXPERTS, H, H)); bq = init(ks[5], (N_EXPERTS, H))
    wk = init(ks[6], (N_EXPERTS, H, H)); bk = init(ks[7], (N_EXPERTS, H))
    wv = init(ks[8], (N_EXPERTS, H, H)); bv = init(ks[9], (N_EXPERTS, H))
    wo = init(ks[10], (N_EXPERTS, H, H)); bo = init(ks[11], (N_EXPERTS, H))
    params = (wq, bq, wk, bk, wv, bv, wo, bo)

    out, eid = expert_attention_jit(hidden_states, attention_mask,
                                    routing_states, centers, params)
    out = jax.block_until_ready(out)

    ref_out, ref_eid = reference(hidden_states, attention_mask,
                                 routing_states, centers, params)
    assert bool(jnp.all(eid == ref_eid)), "routing mismatch"
    assert bool(jnp.allclose(out, ref_out, atol=1e-4, rtol=1e-4)), "output mismatch"

    print("KERNEL_OK")
</pallas_src>

<mosaic_0001>
module attributes {stable_mosaic.version = 11 : i64} {
  func.func @moe_mha_kernel(%arg0: memref<4x8x32xf32, #tpu.memory_space<vmem>>, %arg1: memref<16x1x8xf32, #tpu.memory_space<vmem>>, %arg2: memref<16x32x8xf32, #tpu.memory_space<vmem>>, %arg3: memref<16x1x8xf32, #tpu.memory_space<vmem>>, %arg4: memref<16x32x8xf32, #tpu.memory_space<vmem>>, %arg5: memref<16x1x8xf32, #tpu.memory_space<vmem>>, %arg6: memref<16x32x8xf32, #tpu.memory_space<vmem>>, %arg7: memref<16x1x8xf32, #tpu.memory_space<vmem>>, %arg8: memref<16x8x32xf32, #tpu.memory_space<vmem>>, %arg9: memref<4x1x32xf32, #tpu.memory_space<vmem>>, %arg10: memref<4x8x32xf32, #tpu.memory_space<vmem>>) attributes {dimension_semantics = [], scalar_prefetch = 0 : i64, scratch_operands = 0 : i64, tpu.core_type = #tpu.core_type<tc>} {
    %c0 = arith.constant 0 : index
    %c0_0 = arith.constant 0 : index
    %c0_1 = arith.constant 0 : index
    %0 = vector.load %arg0[%c0, %c0_0, %c0_1] : memref<4x8x32xf32, #tpu.memory_space<vmem>>, vector<4x8x32xf32>
    %1 = vector.shape_cast %0 : vector<4x8x32xf32> to vector<4x1x8x32xf32>
    %2 = vector.shape_cast %1 : vector<4x1x8x32xf32> to vector<4x1x8x32xf32>
    %3 = vector.broadcast %2 : vector<4x1x8x32xf32> to vector<4x4x8x32xf32>
    %4 = vector.shape_cast %3 : vector<4x4x8x32xf32> to vector<16x8x32xf32>
    %c0_2 = arith.constant 0 : index
    %c0_3 = arith.constant 0 : index
    %c0_4 = arith.constant 0 : index
    %5 = vector.load %arg2[%c0_2, %c0_3, %c0_4] : memref<16x32x8xf32, #tpu.memory_space<vmem>>, vector<16x32x8xf32>
    "tpu.trace_start"() <{level = 10 : i32, message = "gsh,ghd->gsd"}> : () -> ()
    %cst = arith.constant dense<0.000000e+00> : vector<16x8x8xf32>
    %6 = tpu.matmul %4, %5, %cst {dimension_numbers = #tpu.dot_dimension_numbers<[2], [1], [1], [2], [0, 0, 0, 1, 1, 2], [0], [0]>} : vector<16x8x32xf32>, vector<16x32x8xf32>, vector<16x8x8xf32> -> vector<16x8x8xf32>
    "tpu.trace_stop"() : () -> ()
    %c0_5 = arith.constant 0 : index
    %c0_6 = arith.constant 0 : index
    %c0_7 = arith.constant 0 : index
    %7 = vector.load %arg3[%c0_5, %c0_6, %c0_7] : memref<16x1x8xf32, #tpu.memory_space<vmem>>, vector<16x1x8xf32>
    %8 = vector.broadcast %7 : vector<16x1x8xf32> to vector<16x8x8xf32>
    %9 = arith.addf %6, %8 : vector<16x8x8xf32>
    %c0_8 = arith.constant 0 : index
    %c0_9 = arith.constant 0 : index
    %c0_10 = arith.constant 0 : index
    %10 = vector.load %arg4[%c0_8, %c0_9, %c0_10] : memref<16x32x8xf32, #tpu.memory_space<vmem>>, vector<16x32x8xf32>
    "tpu.trace_start"() <{level = 10 : i32, message = "gsh,ghd->gsd"}> : () -> ()
    %cst_11 = arith.constant dense<0.000000e+00> : vector<16x8x8xf32>
    %11 = tpu.matmul %4, %10, %cst_11 {dimension_numbers = #tpu.dot_dimension_numbers<[2], [1], [1], [2], [0, 0, 0, 1, 1, 2], [0], [0]>} : vector<16x8x32xf32>, vector<16x32x8xf32>, vector<16x8x8xf32> -> vector<16x8x8xf32>
    "tpu.trace_stop"() : () -> ()
    %c0_12 = arith.constant 0 : index
    %c0_13 = arith.constant 0 : index
    %c0_14 = arith.constant 0 : index
    %12 = vector.load %arg5[%c0_12, %c0_13, %c0_14] : memref<16x1x8xf32, #tpu.memory_space<vmem>>, vector<16x1x8xf32>
    %13 = vector.broadcast %12 : vector<16x1x8xf32> to vector<16x8x8xf32>
    %14 = arith.addf %11, %13 : vector<16x8x8xf32>
    %c0_15 = arith.constant 0 : index
    %c0_16 = arith.constant 0 : index
    %c0_17 = arith.constant 0 : index
    %15 = vector.load %arg6[%c0_15, %c0_16, %c0_17] : memref<16x32x8xf32, #tpu.memory_space<vmem>>, vector<16x32x8xf32>
    "tpu.trace_start"() <{level = 10 : i32, message = "gsh,ghd->gsd"}> : () -> ()
    %cst_18 = arith.constant dense<0.000000e+00> : vector<16x8x8xf32>
    %16 = tpu.matmul %4, %15, %cst_18 {dimension_numbers = #tpu.dot_dimension_numbers<[2], [1], [1], [2], [0, 0, 0, 1, 1, 2], [0], [0]>} : vector<16x8x32xf32>, vector<16x32x8xf32>, vector<16x8x8xf32> -> vector<16x8x8xf32>
    "tpu.trace_stop"() : () -> ()
    %c0_19 = arith.constant 0 : index
    %c0_20 = arith.constant 0 : index
    %c0_21 = arith.constant 0 : index
    %17 = vector.load %arg7[%c0_19, %c0_20, %c0_21] : memref<16x1x8xf32, #tpu.memory_space<vmem>>, vector<16x1x8xf32>
    %18 = vector.broadcast %17 : vector<16x1x8xf32> to vector<16x8x8xf32>
    %19 = arith.addf %16, %18 : vector<16x8x8xf32>
    "tpu.trace_start"() <{level = 10 : i32, message = "gqd,gkd->gqk"}> : () -> ()
    %cst_22 = arith.constant dense<0.000000e+00> : vector<16x8x8xf32>
    %20 = tpu.matmul %9, %14, %cst_22 {dimension_numbers = #tpu.dot_dimension_numbers<[2], [2], [1], [1], [0, 0, 0, 1, 1, 1], [0], [0]>} : vector<16x8x8xf32>, vector<16x8x8xf32>, vector<16x8x8xf32> -> vector<16x8x8xf32>
    "tpu.trace_stop"() : () -> ()
    %cst_23 = arith.constant 0.353553385 : f32
    %21 = vector.broadcast %cst_23 : f32 to vector<16x8x8xf32>
    %22 = arith.mulf %20, %21 : vector<16x8x8xf32>
    %c0_24 = arith.constant 0 : index
    %c0_25 = arith.constant 0 : index
    %c0_26 = arith.constant 0 : index
    %23 = vector.load %arg1[%c0_24, %c0_25, %c0_26] : memref<16x1x8xf32, #tpu.memory_space<vmem>>, vector<16x1x8xf32>
    %24 = vector.broadcast %23 : vector<16x1x8xf32> to vector<16x8x8xf32>
    %25 = arith.addf %22, %24 : vector<16x8x8xf32>
    %cst_27 = arith.constant dense<0xFF800000> : vector<16x8xf32>
    %26 = vector.multi_reduction <maximumf>, %25, %cst_27 [2] : vector<16x8x8xf32> to vector<16x8xf32>
    %27 = vector.shape_cast %26 : vector<16x8xf32> to vector<16x8x1xf32>
    %28 = vector.broadcast %27 : vector<16x8x1xf32> to vector<16x8x8xf32>
    %29 = arith.subf %25, %28 : vector<16x8x8xf32>
    %30 = math.exp %29 : vector<16x8x8xf32>
    %cst_28 = arith.constant dense<0.000000e+00> : vector<16x8xf32>
    %31 = vector.multi_reduction <add>, %30, %cst_28 [2] : vector<16x8x8xf32> to vector<16x8xf32>
    %32 = vector.shape_cast %31 : vector<16x8xf32> to vector<16x8x1xf32>
    %33 = tpu.reciprocal %32 : vector<16x8x1xf32> -> vector<16x8x1xf32>
    %34 = vector.broadcast %33 : vector<16x8x1xf32> to vector<16x8x8xf32>
    %35 = arith.mulf %30, %34 : vector<16x8x8xf32>
    "tpu.trace_start"() <{level = 10 : i32, message = "gqk,gkd->gqd"}> : () -> ()
    %cst_29 = arith.constant dense<0.000000e+00> : vector<16x8x8xf32>
    %36 = tpu.matmul %35, %19, %cst_29 {dimension_numbers = #tpu.dot_dimension_numbers<[2], [1], [1], [2], [0, 0, 0, 1, 1, 2], [0], [0]>} : vector<16x8x8xf32>, vector<16x8x8xf32>, vector<16x8x8xf32> -> vector<16x8x8xf32>
    "tpu.trace_stop"() : () -> ()
    %c0_30 = arith.constant 0 : index
    %c0_31 = arith.constant 0 : index
    %c0_32 = arith.constant 0 : index
    %37 = vector.load %arg8[%c0_30, %c0_31, %c0_32] : memref<16x8x32xf32, #tpu.memory_space<vmem>>, vector<16x8x32xf32>
    "tpu.trace_start"() <{level = 10 : i32, message = "gsd,gdo->gso"}> : () -> ()
    %cst_33 = arith.constant dense<0.000000e+00> : vector<16x8x32xf32>
    %38 = tpu.matmul %36, %37, %cst_33 {dimension_numbers = #tpu.dot_dimension_numbers<[2], [1], [1], [2], [0, 0, 0, 1, 1, 2], [0], [0]>} : vector<16x8x8xf32>, vector<16x8x32xf32>, vector<16x8x32xf32> -> vector<16x8x32xf32>
    "tpu.trace_stop"() : () -> ()
    %39 = vector.shape_cast %38 : vector<16x8x32xf32> to vector<4x4x8x32xf32>
    %40 = vector.extract_strided_slice %39 {offsets = [0, 0, 0, 0], sizes = [4, 1, 8, 32], strides = [1, 1, 1, 1]} : vector<4x4x8x32xf32> to vector<4x1x8x32xf32>
    %41 = vector.shape_cast %40 : vector<4x1x8x32xf32> to vector<4x8x32xf32>
    %42 = vector.extract_strided_slice %39 {offsets = [0, 1, 0, 0], sizes = [4, 1, 8, 32], strides = [1, 1, 1, 1]} : vector<4x4x8x32xf32> to vector<4x1x8x32xf32>
    %43 = vector.shape_cast %42 : vector<4x1x8x32xf32> to vector<4x8x32xf32>
    %44 = arith.addf %41, %43 : vector<4x8x32xf32>
    %45 = vector.extract_strided_slice %39 {offsets = [0, 2, 0, 0], sizes = [4, 1, 8, 32], strides = [1, 1, 1, 1]} : vector<4x4x8x32xf32> to vector<4x1x8x32xf32>
    %46 = vector.shape_cast %45 : vector<4x1x8x32xf32> to vector<4x8x32xf32>
    %47 = arith.addf %44, %46 : vector<4x8x32xf32>
    %48 = vector.extract_strided_slice %39 {offsets = [0, 3, 0, 0], sizes = [4, 1, 8, 32], strides = [1, 1, 1, 1]} : vector<4x4x8x32xf32> to vector<4x1x8x32xf32>
    %49 = vector.shape_cast %48 : vector<4x1x8x32xf32> to vector<4x8x32xf32>
    %50 = arith.addf %47, %49 : vector<4x8x32xf32>
    %c0_34 = arith.constant 0 : index
    %c0_35 = arith.constant 0 : index
    %c0_36 = arith.constant 0 : index
    %51 = vector.load %arg9[%c0_34, %c0_35, %c0_36] : memref<4x1x32xf32, #tpu.memory_space<vmem>>, vector<4x1x32xf32>
    %52 = vector.broadcast %51 : vector<4x1x32xf32> to vector<4x8x32xf32>
    %53 = arith.addf %50, %52 : vector<4x8x32xf32>
    %c0_37 = arith.constant 0 : index
    %c0_38 = arith.constant 0 : index
    %c0_39 = arith.constant 0 : index
    %54 = vector.load %arg10[%c0_37, %c0_38, %c0_39] : memref<4x8x32xf32, #tpu.memory_space<vmem>>, vector<4x8x32xf32>
    tpu.vector_store %arg10[%c0_37, %c0_38, %c0_39], %53 {strides = array<i32>} : memref<4x8x32xf32, #tpu.memory_space<vmem>>, vector<4x8x32xf32>,
    return
  }
}

</mosaic_0001>

<bundles_post_ra>
// kernel: expert_attention.1
= control target key start
LH: loop header
LB: loop body
LE: loop exit
PB: predicated region body
PF: predicated region fallthrough
CT: control target
= control target key end

     0   :  { %v9560_v3 = vmov 0.0|0.0   ;;  %vm9561_vm0 = vmmov 0   ;;  %v9562_v11 = vmov 0.0   ;;  %vm216_vm1 = vcmask 261120   ;;  %s11219_s0 = inlined_call_operand.vmem [shape: f32[4,8,32], index: 0, kind: input, shape index: {}]   ;;  %s11220_s1 = inlined_call_operand.vmem [shape: f32[16,1,8], index: 1, kind: input, shape index: {}]   ;;  %s11221_s2 = inlined_call_operand.vmem [shape: f32[16,32,8], index: 2, kind: input, shape index: {}]   ;;  %s11222_s3 = inlined_call_operand.vmem [shape: f32[16,1,8], index: 3, kind: input, shape index: {}]   ;;  %s11223_s4 = inlined_call_operand.vmem [shape: f32[16,32,8], index: 4, kind: input, shape index: {}]   ;;  %s11224_s5 = inlined_call_operand.vmem [shape: f32[16,1,8], index: 5, kind: input, shape index: {}]   ;;  %s11225_s6 = inlined_call_operand.vmem [shape: f32[16,32,8], index: 6, kind: input, shape index: {}]   ;;  %s11226_s7 = inlined_call_operand.vmem [shape: f32[16,1,8], index: 7, kind: input, shape index: {}]   ;;  %s11227_s8 = inlined_call_operand.vmem [shape: f32[16,8,32], index: 8, kind: input, shape index: {}]   ;;  %s11228_s9 = inlined_call_operand.vmem [shape: f32[4,1,32], index: 9, kind: input, shape index: {}]   ;;  %s11229_s10 = inlined_call_operand.hbm [shape: f32[4,8,32], index: 10, kind: output, shape index: {}]  }
   0x1   :  { %v40_v0 = vld [vmem:[%s11221_s2] sm:$0xff]  ;;  %v41_v1 = vld [vmem:[%s11221_s2 + $0x8] sm:$0xff]  ;;  %9178 = vmatprep.subr.bf16.mxu0 %v9560_v3  ;;  %9184 = vmatprep.subr.bf16.mxu1 %v9560_v3  ;;  %v42_v6 = vld [vmem:[%s11221_s2 + $0x10] sm:$0xff] }
   0x2   :  { %v44_v2 = vld [vmem:[%s11221_s2 + $0x20] sm:$0xff]  ;;  %v9179_v4 = vpack.c.bf16 %v41_v1, %v40_v0  ;;  %v45_v5 = vld [vmem:[%s11221_s2 + $0x28] sm:$0xff]  ;;  %v43_v7 = vld [vmem:[%s11221_s2 + $0x18] sm:$0xff]  ;;  %8418 = vmatprep.mubr.msk.f32.mxu0 %vm9561_vm0, %v9562_v11  ;;  %8429 = vmatprep.mubr.msk.f32.mxu1 %vm9561_vm0, %v9562_v11 }
   0x3   :  { %v9185_v8 = vpack.c.bf16 %v45_v5, %v44_v2  ;;  %v46_v9 = vld [vmem:[%s11221_s2 + $0x30] sm:$0xff]  ;;  %v47_v10 = vld [vmem:[%s11221_s2 + $0x38] sm:$0xff]  ;;  %v9182_v12 = vpack.c.bf16 %v43_v7, %v42_v6  ;;  %v48_v14 = vld [vmem:[%s11221_s2 + $0x40] sm:$0xff] }
   0x4   :  { %9180 = vmatpush3.bf16.msra.mxu0 %v9179_v4  ;;  %v9188_v13 = vpack.c.bf16 %v47_v10, %v46_v9  ;;  %v49_v15 = vld [vmem:[%s11221_s2 + $0x48] sm:$0xff]  ;;  %v52_v16 = vld [vmem:[%s11221_s2 + $0x60] sm:$0xff]  ;;  %v50_v21 = vld [vmem:[%s11221_s2 + $0x50] sm:$0xff] }
   0x5   :  { %9186 = vmatpush3.bf16.msra.mxu1 %v9185_v8  ;;  %9181 = vmatprep.subr.bf16.mxu0 %v9560_v3  ;;  %v53_v17 = vld [vmem:[%s11221_s2 + $0x68] sm:$0xff]  ;;  %v9668_v18 = vld [vmem:[%s11219_s0] sm:$0xff]  ;;  %v9191_v19 = vpack.c.bf16 %v49_v15, %v48_v14  ;;  %v51_v22 = vld [vmem:[%s11221_s2 + $0x58] sm:$0xff] }
   0x6   :  { %9187 = vmatprep.subr.bf16.mxu1 %v9560_v3  ;;  %v9197_v20 = vpack.c.bf16 %v53_v17, %v52_v16  ;;  %v54_v23 = vld [vmem:[%s11221_s2 + $0x70] sm:$0xff]  ;;  %v55_v24 = vld [vmem:[%s11221_s2 + $0x78] sm:$0xff]  ;;  %v9194_v25 = vpack.c.bf16 %v51_v22, %v50_v21  ;;  %v56_v27 = vld [vmem:[%s11221_s2 + $0x80] sm:$0xff] }
   0x7   :  { %v9200_v26 = vpack.c.bf16 %v55_v24, %v54_v23  ;;  %v57_v28 = vld [vmem:[%s11221_s2 + $0x88] sm:$0xff]  ;;  %v60_v29 = vld [vmem:[%s11221_s2 + $0xa0] sm:$0xff]  ;;  %v58_v33 = vld [vmem:[%s11221_s2 + $0x90] sm:$0xff] }
   0x8   :  { %9183 = vmatpush3.bf16.msra.mxu0 %v9182_v12  ;;  %v61_v30 = vld [vmem:[%s11221_s2 + $0xa8] sm:$0xff]  ;;  %v9203_v31 = vpack.c.bf16 %v57_v28, %v56_v27  ;;  %v59_v34 = vld [vmem:[%s11221_s2 + $0x98] sm:$0xff]  ;;  %v62_v35 = vld [vmem:[%s11221_s2 + $0xb0] sm:$0xff] }
   0x9   :  { %9189 = vmatpush3.bf16.msra.mxu1 %v9188_v13  ;;  %9190 = vmatprep.subr.bf16.mxu0 %v9560_v3  ;;  %v9209_v32 = vpack.c.bf16 %v61_v30, %v60_v29  ;;  %v63_v36 = vld [vmem:[%s11221_s2 + $0xb8] sm:$0xff]  ;;  %v9206_v37 = vpack.c.bf16 %v59_v34, %v58_v33  ;;  %v64_v39 = vld [vmem:[%s11221_s2 + $0xc0] sm:$0xff]  ;;  %v65_v40 = vld [vmem:[%s11221_s2 + $0xc8] sm:$0xff] }
   0xa   :  { %9196 = vmatprep.subr.bf16.mxu1 %v9560_v3  ;;  %v9212_v38 = vpack.c.bf16 %v63_v36, %v62_v35  ;;  %v68_v41 = vld [vmem:[%s11221_s2 + $0xe0] sm:$0xff]  ;;  %v69_v42 = vld [vmem:[%s11221_s2 + $0xe8] sm:$0xff]  ;;  %v9215_v44 = vpack.c.bf16 %v65_v40, %v64_v39  ;;  %v66_v46 = vld [vmem:[%s11221_s2 + $0xd0] sm:$0xff] }
   0xb   :  { %8419 = vmatmul.mubr.msk.f32.vlgmr.msra.gmra.mrb[0].mxu0 %vm216_vm1, %v9668_v18  ;;  %v9745_v43 = vld [vmem:[%s11219_s0 + $0x8] sm:$0xff]  ;;  %v9221_v45 = vpack.c.bf16 %v69_v42, %v68_v41  ;;  %v67_v47 = vld [vmem:[%s11221_s2 + $0xd8] sm:$0xff]  ;;  %v70_v48 = vld [vmem:[%s11221_s2 + $0xf0] sm:$0xff] }
   0xc   :  { %8430 = vmatmul.mubr.msk.f32.vlgmr.msra.gmra.mrb[0].mxu1 %vm216_vm1, %v9668_v18  ;;  %9192 = vmatpush3.bf16.msra.mxu0 %v9191_v19  ;;  %v71_v49 = vld [vmem:[%s11221_s2 + $0xf8] sm:$0xff]  ;;  %v9218_v50 = vpack.c.bf16 %v67_v47, %v66_v46  ;;  %v72_v52 = vld [vmem:[%s11221_s2 + $0x100] sm:$0xff]  ;;  %v73_v53 = vld [vmem:[%s11221_s2 + $0x108] sm:$0xff] }
   0xd   :  { %9198 = vmatpush3.bf16.msra.mxu1 %v9197_v20  ;;  %9193 = vmatprep.subr.bf16.mxu0 %v9560_v3  ;;  %v9224_v51 = vpack.c.bf16 %v71_v49, %v70_v48  ;;  %v76_v54 = vld [vmem:[%s11221_s2 + $0x120] sm:$0xff]  ;;  %v77_v55 = vld [vmem:[%s11221_s2 + $0x128] sm:$0xff]  ;;  %v9227_v56 = vpack.c.bf16 %v73_v53, %v72_v52  ;;  %v74_v58 = vld [vmem:[%s11221_s2 + $0x110] sm:$0xff] }
   0xe   :  { %9199 = vmatprep.subr.bf16.mxu1 %v9560_v3  ;;  %8440 = vmatprep.mubr.msk.f32.mxu0 %vm9561_vm0, %v9562_v11  ;;  %v9233_v57 = vpack.c.bf16 %v77_v55, %v76_v54  ;;  %v75_v59 = vld [vmem:[%s11221_s2 + $0x118] sm:$0xff]  ;;  %v78_v60 = vld [vmem:[%s11221_s2 + $0x130] sm:$0xff]  ;;  %v80_v0 = vld [vmem:[%s11221_s2 + $0x140] sm:$0xff] }
   0xf   :  { %8451 = vmatprep.mubr.msk.f32.mxu1 %vm9561_vm0, %v9562_v11  ;;  %v79_v61 = vld [vmem:[%s11221_s2 + $0x138] sm:$0xff]  ;;  %v9230_v62 = vpack.c.bf16 %v75_v59, %v74_v58  ;;  %v81_v1 = vld [vmem:[%s11221_s2 + $0x148] sm:$0xff]  ;;  %v84_v2 = vld [vmem:[%s11221_s2 + $0x160] sm:$0xff] }
  0x10   :  { %9195 = vmatpush3.bf16.msra.mxu0 %v9194_v25  ;;  %v9236_v63 = vpack.c.bf16 %v79_v61, %v78_v60  ;;  %v85_v4 = vld [vmem:[%s11221_s2 + $0x168] sm:$0xff]  ;;  %v9822_v5 = vld [vmem:[%s11219_s0 + $0x10] sm:$0xff]  ;;  %v9239_v6 = vpack.c.bf16 %v81_v1, %v80_v0  ;;  %v83_v9 = vld [vmem:[%s11221_s2 + $0x158] sm:$0xff] }
  0x11   :  { %9201 = vmatpush3.bf16.msra.mxu1 %v9200_v26  ;;  %9202 = vmatprep.subr.bf16.mxu0 %v9560_v3  ;;  %v9245_v7 = vpack.c.bf16 %v85_v4, %v84_v2  ;;  %v82_v8 = vld [vmem:[%s11221_s2 + $0x150] sm:$0xff]  ;;  %v87_v12 = vld [vmem:[%s11221_s2 + $0x178] sm:$0xff]  ;;  %v88_v15 = vld [vmem:[%s11221_s2 + $0x180] sm:$0xff] }
  0x12   :  { %9208 = vmatprep.subr.bf16.mxu1 %v9560_v3  ;;  %v86_v10 = vld [vmem:[%s11221_s2 + $0x170] sm:$0xff]  ;;  %v9242_v13 = vpack.c.bf16 %v83_v9, %v82_v8  ;;  %v89_v16 = vld [vmem:[%s11221_s2 + $0x188] sm:$0xff]  ;;  %v92_v17 = vld [vmem:[%s11221_s2 + $0x1a0] sm:$0xff] }
  0x13   :  { %8441 = vmatmul.mubr.msk.f32.vlgmr.msra.gmra.mrb[2].mxu0 %vm216_vm1, %v9668_v18  ;;  %v9248_v14 = vpack.c.bf16 %v87_v12, %v86_v10  ;;  %v93_v19 = vld [vmem:[%s11221_s2 + $0x1a8] sm:$0xff] }
  0x14   :  { %8452 = vmatmul.mubr.msk.f32.vlgmr.msra.gmra.mrb[2].mxu1 %vm216_vm1, %v9668_v18  ;;  %9204 = vmatpush3.bf16.msra.mxu0 %v9203_v31 }
  0x15   :  { %9210 = vmatpush3.bf16.msra.mxu1 %v9209_v32  ;;  %9205 = vmatprep.subr.bf16.mxu0 %v9560_v3 }
  0x16   :  { %9211 = vmatprep.subr.bf16.mxu1 %v9560_v3  ;;  %8462 = vmatprep.mubr.msk.f32.mxu0 %vm9561_vm0, %v9562_v11 }
  0x17   :  { %8473 = vmatprep.mubr.msk.f32.mxu1 %vm9561_vm0, %v9562_v11 }
  0x18   :  { %9207 = vmatpush3.bf16.msra.mxu0 %v9206_v37 }
  0x19   :  { %9213 = vmatpush3.bf16.msra.mxu1 %v9212_v38  ;;  %9214 = vmatprep.subr.bf16.mxu0 %v9560_v3 }
  0x1a   :  { %9220 = vmatprep.subr.bf16.mxu1 %v9560_v3 }
  0x1b   :  { %8463 = vmatmul.mubr.msk.f32.vlgmr.msra.gmra.mrb[4].mxu0 %vm216_vm1, %v9745_v43 }
  0x1c   :  { %8474 = vmatmul.mubr.msk.f32.vlgmr.msra.gmra.mrb[4].mxu1 %vm216_vm1, %v9745_v43  ;;  %9216 = vmatpush3.bf16.msra.mxu0 %v9215_v44 }
  0x1d   :  { %9222 = vmatpush3.bf16.msra.mxu1 %v9221_v45  ;;  %9217 = vmatprep.subr.bf16.mxu0 %v9560_v3 }
  0x1e   :  { %9223 = vmatprep.subr.bf16.mxu1 %v9560_v3  ;;  %8484 = vmatprep.mubr.msk.f32.mxu0 %vm9561_vm0, %v9562_v11 }
  0x1f   :  { %8495 = vmatprep.mubr.msk.f32.mxu1 %vm9561_vm0, %v9562_v11 }
  0x20   :  { %9219 = vmatpush3.bf16.msra.mxu0 %v9218_v50 }
  0x21   :  { %9225 = vmatpush3.bf16.msra.mxu1 %v9224_v51  ;;  %9226 = vmatprep.subr.bf16.mxu0 %v9560_v3 }
  0x22   :  { %9232 = vmatprep.subr.bf16.mxu1 %v9560_v3 }
  0x23   :  { %8485 = vmatmul.mubr.msk.f32.vlgmr.msra.gmra.mrb[6].mxu0 %vm216_vm1, %v9745_v43 }
  0x24   :  { %8496 = vmatmul.mubr.msk.f32.vlgmr.msra.gmra.mrb[6].mxu1 %vm216_vm1, %v9745_v43  ;;  %9228 = vmatpush3.bf16.msra.mxu0 %v9227_v56 }
  0x25   :  { %9234 = vmatpush3.bf16.msra.mxu1 %v9233_v57  ;;  %9229 = vmatprep.subr.bf16.mxu0 %v9560_v3 }
  0x26   :  { %9235 = vmatprep.subr.bf16.mxu1 %v9560_v3  ;;  %8506 = vmatprep.mubr.msk.f32.mxu0 %vm9561_vm0, %v9562_v11 }
  0x27   :  { %8517 = vmatprep.mubr.msk.f32.mxu1 %vm9561_vm0, %v9562_v11 }
  0x28   :  { %9231 = vmatpush3.bf16.msra.mxu0 %v9230_v62 }
  0x29   :  { %9237 = vmatpush3.bf16.msra.mxu1 %v9236_v63  ;;  %9238 = vmatprep.subr.bf16.mxu0 %v9560_v3 }
  0x2a   :  { %9244 = vmatprep.subr.bf16.mxu1 %v9560_v3 }
  0x2b   :  { %8507 = vmatmul.mubr.msk.f32.vlgmr.msra.gmra.mrb[8].mxu0 %vm216_vm1, %v9822_v5 }
  0x2c   :  { %8518 = vmatmul.mubr.msk.f32.vlgmr.msra.gmra.mrb[8].mxu1 %vm216_vm1, %v9822_v5  ;;  %9240 = vmatpush3.bf16.msra.mxu0 %v9239_v6 }
  0x2d   :  { %9246 = vmatpush3.bf16.msra.mxu1 %v9245_v7  ;;  %9241 = vmatprep.subr.bf16.mxu0 %v9560_v3 }
  0x2e   :  { %9247 = vmatprep.subr.bf16.mxu1 %v9560_v3  ;;  %8528 = vmatprep.mubr.msk.f32.mxu0 %vm9561_vm0, %v9562_v11 }
  0x2f   :  { %15 = vsyncpa [#allocation3], 0  ;;  %8539 = vmatprep.mubr.msk.f32.mxu1 %vm9561_vm0, %v9562_v11  ;;  %v9251_v20 = vpack.c.bf16 %v89_v16, %v88_v15  ;;  %v9257_v21 = vpack.c.bf16 %v93_v19, %v92_v17  ;;  %v90_v22 = vld [vmem:[%s11221_s2 + $0x190] sm:$0xff]  ;;  %v91_v23 = vld [vmem:[%s11221_s2 + $0x198] sm:$0xff]  ;;  %vm3941_vm2 = vcmask 64512   ;;  %s9563_s24 = smov [#allocation2]  }
  0x30   :  { %9243 = vmatpush3.bf16.msra.mxu0 %v9242_v13  ;;  %v94_v24 = vld [vmem:[%s11221_s2 + $0x1b0] sm:$0xff]  ;;  %v95_v25 = vld [vmem:[%s11221_s2 + $0x1b8] sm:$0xff]  ;;  %v9254_v26 = vpack.c.bf16 %v91_v23, %v90_v22  ;;  %v96_v28 = vld [vmem:[%s11221_s2 + $0x1c0] sm:$0xff]  ;;  %s7883_s25 = sshll.u32 %s9563_s24, 4  ;;  %s7884_s25 = int_to_ptr.vmem [resolvable:$true] %s7883_s25 }
  0x31   :  { %9249 = vmatpush3.bf16.msra.mxu1 %v9248_v14  ;;  %9250 = vmatprep.subr.bf16.mxu0 %v9560_v3  ;;  %v9260_v27 = vpack.c.bf16 %v95_v25, %v94_v24  ;;  %v97_v29 = vld [vmem:[%s11221_s2 + $0x1c8] sm:$0xff]  ;;  %v100_v30 = vld [vmem:[%s11221_s2 + $0x1e0] sm:$0xff]  ;;  %v9899_v32 = vld [vmem:[%s11219_s0 + $0x18] sm:$0xff]  ;;  %s9536_s26 = scalar_lea.vmem %s7884_s25, 512  ;;  %p9541_p1 = scmp.lt.s32.totalorder %s7884_s25, %s7884_s25 }
  0x32   :  { %9256 = vmatprep.subr.bf16.mxu1 %v9560_v3  ;;  %v101_v31 = vld [vmem:[%s11221_s2 + $0x1e8] sm:$0xff]  ;;  %v9263_v33 = vpack.c.bf16 %v97_v29, %v96_v28  ;;  %v98_v35 = vld [vmem:[%s11221_s2 + $0x1d0] sm:$0xff]  ;;  %v99_v36 = vld [vmem:[%s11221_s2 + $0x1d8] sm:$0xff]  ;;  %p9537_p0 = scmp.ne.s32.totalorder %s7884_s25, %s9536_s26  ;;  %p9542_p2 = scmp.lt.s32.totalorder %s9536_s26, %s9536_s26 }
  0x33   :  { %8529 = vmatmul.mubr.msk.f32.vlgmr.msra.gmra.mrb[10].mxu0 %vm216_vm1, %v9822_v5  ;;  %v9269_v34 = vpack.c.bf16 %v101_v31, %v100_v30  ;;  %v102_v37 = vld [vmem:[%s11221_s2 + $0x1f0] sm:$0xff]  ;;  %v103_v38 = vld [vmem:[%s11221_s2 + $0x1f8] sm:$0xff]  ;;  %v9266_v39 = vpack.c.bf16 %v99_v36, %v98_v35  ;;  %v1349_v41 = vld [vmem:[%s11223_s4] sm:$0xff] }
  0x34   :  { %8540 = vmatmul.mubr.msk.f32.vlgmr.msra.gmra.mrb[10].mxu1 %vm216_vm1, %v9822_v5  ;;  %9252 = vmatpush3.bf16.msra.mxu0 %v9251_v20  ;;  %v9272_v40 = vpack.c.bf16 %v103_v38, %v102_v37  ;;  %v1350_v42 = vld [vmem:[%s11223_s4 + $0x8] sm:$0xff]  ;;  %v1353_v44 = vld [vmem:[%s11223_s4 + $0x20] sm:$0xff]  ;;  %v1351_v48 = vld [vmem:[%s11223_s4 + $0x10] sm:$0xff]  ;;  %p9543_p3 = por %p9542_p2, %p9541_p1 }
  0x35   :  { %9258 = vmatpush3.bf16.msra.mxu1 %v9257_v21  ;;  %9253 = vmatprep.subr.bf16.mxu0 %v9560_v3  ;;  %v1354_v45 = vld [vmem:[%s11223_s4 + $0x28] sm:$0xff]  ;;  %v9275_v46 = vpack.c.bf16 %v1350_v42, %v1349_v41  ;;  %v1352_v49 = vld [vmem:[%s11223_s4 + $0x18] sm:$0xff]  ;;  %v1355_v50 = vld [vmem:[%s11223_s4 + $0x30] sm:$0xff] }
  0x36   :  { %9259 = vmatprep.subr.bf16.mxu1 %v9560_v3  ;;  %8550 = vmatprep.mubr.msk.f32.mxu0 %vm9561_vm0, %v9562_v11  ;;  %v9281_v47 = vpack.c.bf16 %v1354_v45, %v1353_v44  ;;  %v1356_v51 = vld [vmem:[%s11223_s4 + $0x38] sm:$0xff]  ;;  %v9278_v52 = vpack.c.bf16 %v1352_v49, %v1351_v48  ;;  %v1357_v54 = vld [vmem:[%s11223_s4 + $0x40] sm:$0xff]  ;;  %v1358_v55 = vld [vmem:[%s11223_s4 + $0x48] sm:$0xff]  ;;  %p9544_p4 = pnand %p9543_p3, %p9537_p0 }
  0x37   :  { %8561 = vmatprep.mubr.msk.f32.mxu1 %vm9561_vm0, %v9562_v11  ;;  %v9284_v53 = vpack.c.bf16 %v1356_v51, %v1355_v50  ;;  %v1361_v56 = vld [vmem:[%s11223_s4 + $0x60] sm:$0xff]  ;;  %v1362_v57 = vld [vmem:[%s11223_s4 + $0x68] sm:$0xff]  ;;  %v9287_v58 = vpack.c.bf16 %v1358_v55, %v1357_v54  ;;  %v1359_v60 = vld [vmem:[%s11223_s4 + $0x50] sm:$0xff] }
  0x38   :  { %9255 = vmatpush3.bf16.msra.mxu0 %v9254_v26  ;;  %v9293_v59 = vpack.c.bf16 %v1362_v57, %v1361_v56  ;;  %v1360_v61 = vld [vmem:[%s11223_s4 + $0x58] sm:$0xff]  ;;  %v1363_v62 = vld [vmem:[%s11223_s4 + $0x70] sm:$0xff]  ;;  %v1365_v2 = vld [vmem:[%s11223_s4 + $0x80] sm:$0xff] }
  0x39   :  { %9261 = vmatpush3.bf16.msra.mxu1 %v9260_v27  ;;  %9262 = vmatprep.subr.bf16.mxu0 %v9560_v3  ;;  %v1364_v63 = vld [vmem:[%s11223_s4 + $0x78] sm:$0xff]  ;;  %v9290_v0 = vpack.c.bf16 %v1360_v61, %v1359_v60  ;;  %v1366_v4 = vld [vmem:[%s11223_s4 + $0x88] sm:$0xff]  ;;  %v1369_v6 = vld [vmem:[%s11223_s4 + $0xa0] sm:$0xff] }
  0x3a   :  { %9268 = vmatprep.subr.bf16.mxu1 %v9560_v3  ;;  %v9296_v1 = vpack.c.bf16 %v1364_v63, %v1363_v62  ;;  %v1370_v7 = vld [vmem:[%s11223_s4 + $0xa8] sm:$0xff]  ;;  %v9299_v8 = vpack.c.bf16 %v1366_v4, %v1365_v2  ;;  %v1367_v10 = vld [vmem:[%s11223_s4 + $0x90] sm:$0xff]  ;;  %v1368_v12 = vld [vmem:[%s11223_s4 + $0x98] sm:$0xff] }
  0x3b   :  { %8551 = vmatmul.mubr.msk.f32.vlgmr.msra.gmra.mrb[12].mxu0 %vm216_vm1, %v9899_v32  ;;  %v9305_v9 = vpack.c.bf16 %v1370_v7, %v1369_v6  ;;  %v1371_v13 = vld [vmem:[%s11223_s4 + $0xb0] sm:$0xff]  ;;  %v1372_v14 = vld [vmem:[%s11223_s4 + $0xb8] sm:$0xff]  ;;  %v9302_v15 = vpack.c.bf16 %v1368_v12, %v1367_v10  ;;  %v1373_v17 = vld [vmem:[%s11223_s4 + $0xc0] sm:$0xff] }
  0x3c   :  { %8562 = vmatmul.mubr.msk.f32.vlgmr.msra.gmra.mrb[12].mxu1 %vm216_vm1, %v9899_v32  ;;  %9264 = vmatpush3.bf16.msra.mxu0 %v9263_v33  ;;  %v9308_v16 = vpack.c.bf16 %v1372_v14, %v1371_v13  ;;  %v1374_v19 = vld [vmem:[%s11223_s4 + $0xc8] sm:$0xff]  ;;  %v1377_v20 = vld [vmem:[%s11223_s4 + $0xe0] sm:$0xff]  ;;  %v1375_v24 = vld [vmem:[%s11223_s4 + $0xd0] sm:$0xff] }
  0x3d   :  { %9270 = vmatpush3.bf16.msra.mxu1 %v9269_v34  ;;  %9265 = vmatprep.subr.bf16.mxu0 %v9560_v3  ;;  %v1378_v21 = vld [vmem:[%s11223_s4 + $0xe8] sm:$0xff]  ;;  %v9311_v22 = vpack.c.bf16 %v1374_v19, %v1373_v17  ;;  %v1376_v25 = vld [vmem:[%s11223_s4 + $0xd8] sm:$0xff]  ;;  %v1379_v26 = vld [vmem:[%s11223_s4 + $0xf0] sm:$0xff] }
  0x3e   :  { %9271 = vmatprep.subr.bf16.mxu1 %v9560_v3  ;;  %8572 = vmatprep.mubr.msk.f32.mxu0 %vm9561_vm0, %v9562_v11  ;;  %v9317_v23 = vpack.c.bf16 %v1378_v21, %v1377_v20  ;;  %v1380_v27 = vld [vmem:[%s11223_s4 + $0xf8] sm:$0xff]  ;;  %v9314_v28 = vpack.c.bf16 %v1376_v25, %v1375_v24  ;;  %v1381_v30 = vld [vmem:[%s11223_s4 + $0x100] sm:$0xff]  ;;  %v1382_v31 = vld [vmem:[%s11223_s4 + $0x108] sm:$0xff] }
  0x3f   :  { %8583 = vmatprep.mubr.msk.f32.mxu1 %vm9561_vm0, %v9562_v11  ;;  %v9320_v29 = vpack.c.bf16 %v1380_v27, %v1379_v26  ;;  %v1385_v33 = vld [vmem:[%s11223_s4 + $0x120] sm:$0xff]  ;;  %v1386_v34 = vld [vmem:[%s11223_s4 + $0x128] sm:$0xff]  ;;  %v9323_v35 = vpack.c.bf16 %v1382_v31, %v1381_v30  ;;  %v1383_v37 = vld [vmem:[%s11223_s4 + $0x110] sm:$0xff] }
  0x40   :  { %9267 = vmatpush3.bf16.msra.mxu0 %v9266_v39  ;;  %v9329_v36 = vpack.c.bf16 %v1386_v34, %v1385_v33  ;;  %v1384_v38 = vld [vmem:[%s11223_s4 + $0x118] sm:$0xff]  ;;  %v1387_v39 = vld [vmem:[%s11223_s4 + $0x130] sm:$0xff]  ;;  %v1389_v44 = vld [vmem:[%s11223_s4 + $0x140] sm:$0xff] }
  0x41   :  { %9273 = vmatpush3.bf16.msra.mxu1 %v9272_v40  ;;  %9274 = vmatprep.subr.bf16.mxu0 %v9560_v3  ;;  %v1388_v40 = vld [vmem:[%s11223_s4 + $0x138] sm:$0xff]  ;;  %v9326_v41 = vpack.c.bf16 %v1384_v38, %v1383_v37  ;;  %v1390_v45 = vld [vmem:[%s11223_s4 + $0x148] sm:$0xff]  ;;  %v1391_v50 = vld [vmem:[%s11223_s4 + $0x150] sm:$0xff] }
  0x42   :  { %9280 = vmatprep.subr.bf16.mxu1 %v9560_v3  ;;  %v9332_v42 = vpack.c.bf16 %v1388_v40, %v1387_v39  ;;  %v9335_v48 = vpack.c.bf16 %v1390_v45, %v1389_v44  ;;  %v1392_v51 = vld [vmem:[%s11223_s4 + $0x158] sm:$0xff]  ;;  %v1397_v56 = vld [vmem:[%s11223_s4 + $0x180] sm:$0xff]  ;;  %v1398_v57 = vld [vmem:[%s11223_s4 + $0x188] sm:$0xff] }
  0x43   :  { %8573 = vmatmul.mubr.msk.f32.vlgmr.msra.gmra.mrb[14].mxu0 %vm216_vm1, %v9899_v32  ;;  %v9338_v54 = vpack.c.bf16 %v1392_v51, %v1391_v50  ;;  %v9347_v60 = vpack.c.bf16 %v1398_v57, %v1397_v56  ;;  %v1399_v62 = vld [vmem:[%s11223_s4 + $0x190] sm:$0xff]  ;;  %v1400_v63 = vld [vmem:[%s11223_s4 + $0x198] sm:$0xff]  ;;  %v1405_v6 = vld [vmem:[%s11223_s4 + $0x1c0] sm:$0xff] }
  0x44   :  { %8584 = vmatmul.mubr.msk.f32.vlgmr.msra.gmra.mrb[14].mxu1 %vm216_vm1, %v9899_v32  ;;  %9276 = vmatpush3.bf16.msra.mxu0 %v9275_v46  ;;  %v1393_v46 = vld [vmem:[%s11223_s4 + $0x160] sm:$0xff]  ;;  %v9350_v2 = vpack.c.bf16 %v1400_v63, %v1399_v62  ;;  %v1406_v7 = vld [vmem:[%s11223_s4 + $0x1c8] sm:$0xff]  ;;  %v1407_v13 = vld [vmem:[%s11223_s4 + $0x1d0] sm:$0xff] }
  0x45   :  { %9282 = vmatpush3.bf16.msra.mxu1 %v9281_v47  ;;  %9277 = vmatprep.subr.bf16.mxu0 %v9560_v3  ;;  %v1394_v47 = vld [vmem:[%s11223_s4 + $0x168] sm:$0xff]  ;;  %v9359_v10 = vpack.c.bf16 %v1406_v7, %v1405_v6  ;;  %v1408_v14 = vld [vmem:[%s11223_s4 + $0x1d8] sm:$0xff]  ;;  %v2645_v20 = vld [vmem:[%s11225_s6] sm:$0xff] }
  0x46   :  { %9283 = vmatprep.subr.bf16.mxu1 %v9560_v3  ;;  %8594 = vmatprep.mubr.msk.f32.mxu0 %vm9561_vm0, %v9562_v11  ;;  %v9341_v49 = vpack.c.bf16 %v1394_v47, %v1393_v46  ;;  %v9362_v17 = vpack.c.bf16 %v1408_v14, %v1407_v13  ;;  %v2646_v21 = vld [vmem:[%s11225_s6 + $0x8] sm:$0xff]  ;;  %v2647_v26 = vld [vmem:[%s11225_s6 + $0x10] sm:$0xff]  ;;  %v2648_v27 = vld [vmem:[%s11225_s6 + $0x18] sm:$0xff] }
  0x47   :  { %8605 = vmatprep.mubr.msk.f32.mxu1 %vm9561_vm0, %v9562_v11  ;;  %v9371_v24 = vpack.c.bf16 %v2646_v21, %v2645_v20  ;;  %v9374_v30 = vpack.c.bf16 %v2648_v27, %v2647_v26  ;;  %v2653_v33 = vld [vmem:[%s11225_s6 + $0x40] sm:$0xff]  ;;  %v2654_v34 = vld [vmem:[%s11225_s6 + $0x48] sm:$0xff]  ;;  %v2655_v39 = vld [vmem:[%s11225_s6 + $0x50] sm:$0xff] }
  0x48   :  { %9279 = vmatpush3.bf16.msra.mxu0 %v9278_v52  ;;  %v1395_v52 = vld [vmem:[%s11223_s4 + $0x170] sm:$0xff]  ;;  %v9383_v37 = vpack.c.bf16 %v2654_v34, %v2653_v33  ;;  %v2656_v40 = vld [vmem:[%s11225_s6 + $0x58] sm:$0xff]  ;;  %v2661_v46 = vld [vmem:[%s11225_s6 + $0x80] sm:$0xff] }
  0x49   :  { %9285 = vmatpush3.bf16.msra.mxu1 %v9284_v53  ;;  %9286 = vmatprep.subr.bf16.mxu0 %v9560_v3  ;;  %v1396_v53 = vld [vmem:[%s11223_s4 + $0x178] sm:$0xff]  ;;  %v9386_v44 = vpack.c.bf16 %v2656_v40, %v2655_v39  ;;  %v2662_v47 = vld [vmem:[%s11225_s6 + $0x88] sm:$0xff]  ;;  %v2671_v63 = vld [vmem:[%s11225_s6 + $0xd0] sm:$0xff] }
  0x4a   :  { %9292 = vmatprep.subr.bf16.mxu1 %v9560_v3  ;;  %v9344_v55 = vpack.c.bf16 %v1396_v53, %v1395_v52  ;;  %v9395_v50 = vpack.c.bf16 %v2662_v47, %v2661_v46  ;;  %v2663_v52 = vld [vmem:[%s11225_s6 + $0x90] sm:$0xff]  ;;  %v2664_v53 = vld [vmem:[%s11225_s6 + $0x98] sm:$0xff]  ;;  %v2677_v7 = vld [vmem:[%s11225_s6 + $0x100] sm:$0xff] }
  0x4b   :  { %8595 = vmatmul.mubr.msk.f32.vlgmr.msra.gmra.mrb[16].mxu0 %vm216_vm1, %v9668_v18  ;;  %v9398_v56 = vpack.c.bf16 %v2664_v53, %v2663_v52  ;;  %v2679_v14 = vld [vmem:[%s11225_s6 + $0x110] sm:$0xff]  ;;  %v2685_v21 = vld [vmem:[%s11225_s6 + $0x140] sm:$0xff]  ;;  %v2688_v27 = vld [vmem:[%s11225_s6 + $0x158] sm:$0xff] }
  0x4c   :  { %8606 = vmatmul.mubr.msk.f32.vlgmr.msra.gmra.mrb[16].mxu1 %vm216_vm1, %v9668_v18  ;;  %9288 = vmatpush3.bf16.msra.mxu0 %v9287_v58  ;;  %v1401_v58 = vld [vmem:[%s11223_s4 + $0x1a0] sm:$0xff]  ;;  %v2687_v26 = vld [vmem:[%s11225_s6 + $0x150] sm:$0xff]  ;;  %v2694_v34 = vld [vmem:[%s11225_s6 + $0x188] sm:$0xff] }
  0x4d   :  { %9294 = vmatpush3.bf16.msra.mxu1 %v9293_v59  ;;  %9289 = vmatprep.subr.bf16.mxu0 %v9560_v3  ;;  %v1402_v59 = vld [vmem:[%s11223_s4 + $0x1a8] sm:$0xff]  ;;  %v2693_v33 = vld [vmem:[%s11225_s6 + $0x180] sm:$0xff]  ;;  %v2695_v39 = vld [vmem:[%s11225_s6 + $0x190] sm:$0xff] }
  0x4e   :  { %9295 = vmatprep.subr.bf16.mxu1 %v9560_v3  ;;  %8616 = vmatprep.mubr.msk.f32.mxu0 %vm9561_vm0, %v9562_v11  ;;  %v9353_v61 = vpack.c.bf16 %v1402_v59, %v1401_v58  ;;  %v2669_v58 = vld [vmem:[%s11225_s6 + $0xc0] sm:$0xff]  ;;  %v2670_v59 = vld [vmem:[%s11225_s6 + $0xc8] sm:$0xff]  ;;  %v2696_v40 = vld [vmem:[%s11225_s6 + $0x198] sm:$0xff] }
  0x4f   :  { %8627 = vmatprep.mubr.msk.f32.mxu1 %vm9561_vm0, %v9562_v11  ;;  %v2701_v46 = vld [vmem:[%s11225_s6 + $0x1c0] sm:$0xff]  ;;  %v2702_v47 = vld [vmem:[%s11225_s6 + $0x1c8] sm:$0xff]  ;;  %v2704_v52 = vld [vmem:[%s11225_s6 + $0x1d8] sm:$0xff] }
  0x50   :  { %9291 = vmatpush3.bf16.msra.mxu0 %v9290_v0  ;;  %v1403_v0 = vld [vmem:[%s11223_s4 + $0x1b0] sm:$0xff] }
  0x51   :  { %9297 = vmatpush3.bf16.msra.mxu1 %v9296_v1  ;;  %9298 = vmatprep.subr.bf16.mxu0 %v9560_v3  ;;  %v1404_v1 = vld [vmem:[%s11223_s4 + $0x1b8] sm:$0xff]  ;;  %v2707_v53 = vld [vmem:[%s11225_s6 + $0x1f0] sm:$0xff] }
  0x52   :  { %9304 = vmatprep.subr.bf16.mxu1 %v9560_v3  ;;  %v9356_v4 = vpack.c.bf16 %v1404_v1, %v1403_v0  ;;  %v2672_v0 = vld [vmem:[%s11225_s6 + $0xd8] sm:$0xff]  ;;  %v2675_v1 = vld [vmem:[%s11225_s6 + $0xf0] sm:$0xff] }
  0x53   :  { %8617 = vmatmul.mubr.msk.f32.vlgmr.msra.gmra.mrb[18].mxu0 %vm216_vm1, %v9668_v18 }
  0x54   :  { %8628 = vmatmul.mubr.msk.f32.vlgmr.msra.gmra.mrb[18].mxu1 %vm216_vm1, %v9668_v18  ;;  %9300 = vmatpush3.bf16.msra.mxu0 %v9299_v8  ;;  %v1409_v8 = vld [vmem:[%s11223_s4 + $0x1e0] sm:$0xff] }
  0x55   :  { %9306 = vmatpush3.bf16.msra.mxu1 %v9305_v9  ;;  %9301 = vmatprep.subr.bf16.mxu0 %v9560_v3  ;;  %v1410_v9 = vld [vmem:[%s11223_s4 + $0x1e8] sm:$0xff] }
  0x56   :  { %9307 = vmatprep.subr.bf16.mxu1 %v9560_v3  ;;  %8638 = vmatprep.mubr.msk.f32.mxu0 %vm9561_vm0, %v9562_v11  ;;  %v9365_v12 = vpack.c.bf16 %v1410_v9, %v1409_v8  ;;  %v2678_v8 = vld [vmem:[%s11225_s6 + $0x108] sm:$0xff]  ;;  %v2681_v9 = vld [vmem:[%s11225_s6 + $0x120] sm:$0xff] }
  0x57   :  { %8649 = vmatprep.mubr.msk.f32.mxu1 %vm9561_vm0, %v9562_v11 }
  0x58   :  { %9303 = vmatpush3.bf16.msra.mxu0 %v9302_v15  ;;  %v1411_v15 = vld [vmem:[%s11223_s4 + $0x1f0] sm:$0xff] }
  0x59   :  { %9309 = vmatpush3.bf16.msra.mxu1 %v9308_v16  ;;  %9310 = vmatprep.subr.bf16.mxu0 %v9560_v3  ;;  %v1412_v16 = vld [vmem:[%s11223_s4 + $0x1f8] sm:$0xff] }
  0x5a   :  { %9316 = vmatprep.subr.bf16.mxu1 %v9560_v3  ;;  %v9368_v19 = vpack.c.bf16 %v1412_v16, %v1411_v15  ;;  %v2680_v15 = vld [vmem:[%s11225_s6 + $0x118] sm:$0xff]  ;;  %v2683_v16 = vld [vmem:[%s11225_s6 + $0x130] sm:$0xff] }
  0x5b   :  { %8639 = vmatmul.mubr.msk.f32.vlgmr.msra.gmra.mrb[20].mxu0 %vm216_vm1, %v9745_v43 }
  0x5c   :  { %8650 = vmatmul.mubr.msk.f32.vlgmr.msra.gmra.mrb[20].mxu1 %vm216_vm1, %v9745_v43  ;;  %9312 = vmatpush3.bf16.msra.mxu0 %v9311_v22  ;;  %v2649_v22 = vld [vmem:[%s11225_s6 + $0x20] sm:$0xff] }
  0x5d   :  { %9318 = vmatpush3.bf16.msra.mxu1 %v9317_v23  ;;  %9313 = vmatprep.subr.bf16.mxu0 %v9560_v3  ;;  %v2650_v23 = vld [vmem:[%s11225_s6 + $0x28] sm:$0xff] }
  0x5e   :  { %9319 = vmatprep.subr.bf16.mxu1 %v9560_v3  ;;  %8660 = vmatprep.mubr.msk.f32.mxu0 %vm9561_vm0, %v9562_v11  ;;  %v9377_v25 = vpack.c.bf16 %v2650_v23, %v2649_v22  ;;  %v2686_v22 = vld [vmem:[%s11225_s6 + $0x148] sm:$0xff] }
  0x5f   :  { %8671 = vmatprep.mubr.msk.f32.mxu1 %vm9561_vm0, %v9562_v11  ;;  %v2690_v23 = vld [vmem:[%s11225_s6 + $0x168] sm:$0xff] }
  0x60   :  { %9315 = vmatpush3.bf16.msra.mxu0 %v9314_v28  ;;  %v2651_v28 = vld [vmem:[%s11225_s6 + $0x30] sm:$0xff] }
  0x61   :  { %9321 = vmatpush3.bf16.msra.mxu1 %v9320_v29  ;;  %9322 = vmatprep.subr.bf16.mxu0 %v9560_v3  ;;  %v2652_v29 = vld [vmem:[%s11225_s6 + $0x38] sm:$0xff] }
  0x62   :  { %9328 = vmatprep.subr.bf16.mxu1 %v9560_v3  ;;  %v9380_v31 = vpack.c.bf16 %v2652_v29, %v2651_v28  ;;  %v2691_v28 = vld [vmem:[%s11225_s6 + $0x170] sm:$0xff]  ;;  %v2692_v29 = vld [vmem:[%s11225_s6 + $0x178] sm:$0xff] }
  0x63   :  { %8661 = vmatmul.mubr.msk.f32.vlgmr.msra.gmra.mrb[22].mxu0 %vm216_vm1, %v9745_v43 }
  0x64   :  { %8672 = vmatmul.mubr.msk.f32.vlgmr.msra.gmra.mrb[22].mxu1 %vm216_vm1, %v9745_v43  ;;  %9324 = vmatpush3.bf16.msra.mxu0 %v9323_v35  ;;  %v2657_v35 = vld [vmem:[%s11225_s6 + $0x60] sm:$0xff] }
  0x65   :  { %9330 = vmatpush3.bf16.msra.mxu1 %v9329_v36  ;;  %9325 = vmatprep.subr.bf16.mxu0 %v9560_v3  ;;  %v2658_v36 = vld [vmem:[%s11225_s6 + $0x68] sm:$0xff] }
  0x66   :  { %9331 = vmatprep.subr.bf16.mxu1 %v9560_v3  ;;  %8682 = vmatprep.mubr.msk.f32.mxu0 %vm9561_vm0, %v9562_v11  ;;  %v9389_v38 = vpack.c.bf16 %v2658_v36, %v2657_v35  ;;  %v2697_v35 = vld [vmem:[%s11225_s6 + $0x1a0] sm:$0xff]  ;;  %v2698_v36 = vld [vmem:[%s11225_s6 + $0x1a8] sm:$0xff] }
  0x67   :  { %8693 = vmatprep.mubr.msk.f32.mxu1 %vm9561_vm0, %v9562_v11 }
  0x68   :  { %9327 = vmatpush3.bf16.msra.mxu0 %v9326_v41  ;;  %v2659_v41 = vld [vmem:[%s11225_s6 + $0x70] sm:$0xff] }
  0x69   :  { %9333 = vmatpush3.bf16.msra.mxu1 %v9332_v42  ;;  %9334 = vmatprep.subr.bf16.mxu0 %v9560_v3  ;;  %v2660_v42 = vld [vmem:[%s11225_s6 + $0x78] sm:$0xff] }
  0x6a   :  { %9340 = vmatprep.subr.bf16.mxu1 %v9560_v3  ;;  %v9392_v45 = vpack.c.bf16 %v2660_v42, %v2659_v41  ;;  %v2699_v41 = vld [vmem:[%s11225_s6 + $0x1b0] sm:$0xff]  ;;  %v2700_v42 = vld [vmem:[%s11225_s6 + $0x1b8] sm:$0xff] }
  0x6b   :  { %8683 = vmatmul.mubr.msk.f32.vlgmr.msra.gmra.mrb[24].mxu0 %vm216_vm1, %v9822_v5 }
  0x6c   :  { %8694 = vmatmul.mubr.msk.f32.vlgmr.msra.gmra.mrb[24].mxu1 %vm216_vm1, %v9822_v5  ;;  %9336 = vmatpush3.bf16.msra.mxu0 %v9335_v48  ;;  %v2665_v48 = vld [vmem:[%s11225_s6 + $0xa0] sm:$0xff] }
  0x6d   :  { %9342 = vmatpush3.bf16.msra.mxu1 %v9341_v49  ;;  %9337 = vmatprep.subr.bf16.mxu0 %v9560_v3  ;;  %v2666_v49 = vld [vmem:[%s11225_s6 + $0xa8] sm:$0xff] }
  0x6e   :  { %9343 = vmatprep.subr.bf16.mxu1 %v9560_v3  ;;  %8704 = vmatprep.mubr.msk.f32.mxu0 %vm9561_vm0, %v9562_v11  ;;  %v9401_v51 = vpack.c.bf16 %v2666_v49, %v2665_v48  ;;  %v2706_v48 = vld [vmem:[%s11225_s6 + $0x1e8] sm:$0xff]  ;;  %v9455_v49 = vpack.c.bf16 %v2702_v47, %v2701_v46  ;;  %v7897_v46 = vld [vmem:[%s11222_s3 + $0x3] ss:$0 sm:$0xff] }
  0x6f   :  { %8715 = vmatprep.mubr.msk.f32.mxu1 %vm9561_vm0, %v9562_v11 }
  0x70   :  { %9339 = vmatpush3.bf16.msra.mxu0 %v9338_v54  ;;  %v2667_v54 = vld [vmem:[%s11225_s6 + $0xb0] sm:$0xff] }
  0x71   :  { %9345 = vmatpush3.bf16.msra.mxu1 %v9344_v55  ;;  %9346 = vmatprep.subr.bf16.mxu0 %v9560_v3  ;;  %v2668_v55 = vld [vmem:[%s11225_s6 + $0xb8] sm:$0xff] }
  0x72   :  { %9352 = vmatprep.subr.bf16.mxu1 %v9560_v3  ;;  %v9404_v57 = vpack.c.bf16 %v2668_v55, %v2667_v54  ;;  %v2708_v54 = vld [vmem:[%s11225_s6 + $0x1f8] sm:$0xff] }
  0x73   :  { %8705 = vmatmul.mubr.msk.f32.vlgmr.msra.gmra.mrb[26].mxu0 %vm216_vm1, %v9822_v5 }
  0x74   :  { %8716 = vmatmul.mubr.msk.f32.vlgmr.msra.gmra.mrb[26].mxu1 %vm216_vm1, %v9822_v5  ;;  %9348 = vmatpush3.bf16.msra.mxu0 %v9347_v60  ;;  %v2674_v60 = vld [vmem:[%s11225_s6 + $0xe8] sm:$0xff] }
  0x75   :  { %9354 = vmatpush3.bf16.msra.mxu1 %v9353_v61  ;;  %9349 = vmatprep.subr.bf16.mxu0 %v9560_v3  ;;  %v9407_v61 = vpack.c.bf16 %v2670_v59, %v2669_v58 }
  0x76   :  { %9355 = vmatprep.subr.bf16.mxu1 %v9560_v3  ;;  %8726 = vmatprep.mubr.msk.f32.mxu0 %vm9561_vm0, %v9562_v11 }
  0x77   :  { %8737 = vmatprep.mubr.msk.f32.mxu1 %vm9561_vm0, %v9562_v11 }
  0x78   :  { %9351 = vmatpush3.bf16.msra.mxu0 %v9350_v2  ;;  %v2676_v2 = vld [vmem:[%s11225_s6 + $0xf8] sm:$0xff] }
  0x79   :  { %9357 = vmatpush3.bf16.msra.mxu1 %v9356_v4  ;;  %9358 = vmatprep.subr.bf16.mxu0 %v9560_v3  ;;  %v9410_v4 = vpack.c.bf16 %v2672_v0, %v2671_v63  ;;  %v9416_v6 = vpack.c.bf16 %v2676_v2, %v2675_v1 }
  0x7a   :  { %9364 = vmatprep.subr.bf16.mxu1 %v9560_v3 }
  0x7b   :  { %8727 = vmatmul.mubr.msk.f32.vlgmr.msra.gmra.mrb[28].mxu0 %vm216_vm1, %v9899_v32 }
  0x7c   :  { %8738 = vmatmul.mubr.msk.f32.vlgmr.msra.gmra.mrb[28].mxu1 %vm216_vm1, %v9899_v32  ;;  %9360 = vmatpush3.bf16.msra.mxu0 %v9359_v10  ;;  %v2682_v10 = vld [vmem:[%s11225_s6 + $0x128] sm:$0xff] }
  0x7d   :  { %9366 = vmatpush3.bf16.msra.mxu1 %v9365_v12  ;;  %9361 = vmatprep.subr.bf16.mxu0 %v9560_v3  ;;  %v9419_v12 = vpack.c.bf16 %v2678_v8, %v2677_v7  ;;  %v9425_v13 = vpack.c.bf16 %v2682_v10, %v2681_v9 }
  0x7e   :  { %9367 = vmatprep.subr.bf16.mxu1 %v9560_v3  ;;  %8748 = vmatprep.mubr.msk.f32.mxu0 %vm9561_vm0, %v9562_v11 }
  0x7f   :  { %8759 = vmatprep.mubr.msk.f32.mxu1 %vm9561_vm0, %v9562_v11 }
  0x80   :  { %9363 = vmatpush3.bf16.msra.mxu0 %v9362_v17  ;;  %v2684_v17 = vld [vmem:[%s11225_s6 + $0x138] sm:$0xff] }
  0x81   :  { %9369 = vmatpush3.bf16.msra.mxu1 %v9368_v19  ;;  %9370 = vmatprep.subr.bf16.mxu0 %v9560_v3  ;;  %v9422_v19 = vpack.c.bf16 %v2680_v15, %v2679_v14  ;;  %v9428_v20 = vpack.c.bf16 %v2684_v17, %v2683_v16 }
  0x82   :  { %9376 = vmatprep.subr.bf16.mxu1 %v9560_v3 }
  0x83   :  { %8749 = vmatmul.mubr.msk.f32.vlgmr.msra.gmra.mrb[30].mxu0 %vm216_vm1, %v9899_v32 }
  0x84   :  { %8760 = vmatmul.mubr.msk.f32.vlgmr.msra.gmra.mrb[30].mxu1 %vm216_vm1, %v9899_v32  ;;  %9372 = vmatpush3.bf16.msra.mxu0 %v9371_v24  ;;  %v9431_v24 = vpack.c.bf16 %v2686_v22, %v2685_v21 }
  0x85   :  { %9378 = vmatpush3.bf16.msra.mxu1 %v9377_v25  ;;  %9373 = vmatprep.subr.bf16.mxu0 %v9560_v3 }
  0x86   :  { %9379 = vmatprep.subr.bf16.mxu1 %v9560_v3  ;;  %8770 = vmatprep.mubr.msk.f32.mxu0 %vm9561_vm0, %v9562_v11 }
  0x87   :  { %8781 = vmatprep.mubr.msk.f32.mxu1 %vm9561_vm0, %v9562_v11 }
  0x88   :  { %9375 = vmatpush3.bf16.msra.mxu0 %v9374_v30  ;;  %v9434_v30 = vpack.c.bf16 %v2688_v27, %v2687_v26  ;;  %v7927_v26 = vld [vmem:[%s11224_s5 + $0x1] ss:$0 sm:$0xff] }
  0x89   :  { %9381 = vmatpush3.bf16.msra.mxu1 %v9380_v31  ;;  %9382 = vmatprep.subr.bf16.mxu0 %v9560_v3  ;;  %v9440_v31 = vpack.c.bf16 %v2692_v29, %v2691_v28  ;;  %v7894_v28 = vld [vmem:[%s11222_s3] ss:$0 sm:$0xff] }
  0x8a   :  { %9388 = vmatprep.subr.bf16.mxu1 %v9560_v3 }
  0x8b   :  { %8771 = vmatmul.mubr.msk.f32.vlgmr.msra.gmra.mrb[32].mxu0 %vm216_vm1, %v9668_v18 }
  0x8c   :  { %8782 = vmatmul.mubr.msk.f32.vlgmr.msra.gmra.mrb[32].mxu1 %vm216_vm1, %v9668_v18  ;;  %9384 = vmatpush3.bf16.msra.mxu0 %v9383_v37  ;;  %v9443_v37 = vpack.c.bf16 %v2694_v34, %v2693_v33  ;;  %v7895_v33 = vld [vmem:[%s11222_s3 + $0x1] ss:$0 sm:$0xff] }
  0x8d   :  { %9390 = vmatpush3.bf16.msra.mxu1 %v9389_v38  ;;  %9385 = vmatprep.subr.bf16.mxu0 %v9560_v3  ;;  %v9449_v38 = vpack.c.bf16 %v2698_v36, %v2697_v35 }
  0x8e   :  { %9391 = vmatprep.subr.bf16.mxu1 %v9560_v3  ;;  %8792 = vmatprep.mubr.msk.f32.mxu0 %vm9561_vm0, %v9562_v11 }
  0x8f   :  { %8803 = vmatprep.mubr.msk.f32.mxu1 %vm9561_vm0, %v9562_v11 }
  0x90   :  { %9387 = vmatpush3.bf16.msra.mxu0 %v9386_v44  ;;  %v9446_v44 = vpack.c.bf16 %v2696_v40, %v2695_v39  ;;  %v7929_v39 = vld [vmem:[%s11224_s5 + $0x3] ss:$0 sm:$0xff] }
  0x91   :  { %9393 = vmatpush3.bf16.msra.mxu1 %v9392_v45  ;;  %9394 = vmatprep.subr.bf16.mxu0 %v9560_v3  ;;  %v9452_v45 = vpack.c.bf16 %v2700_v42, %v2699_v41  ;;  %v7896_v41 = vld [vmem:[%s11222_s3 + $0x2] ss:$0 sm:$0xff] }
  0x92   :  { %9400 = vmatprep.subr.bf16.mxu1 %v9560_v3 }
  0x93   :  { %8793 = vmatmul.mubr.msk.f32.vlgmr.msra.gmra.mrb[34].mxu0 %vm216_vm1, %v9668_v18 }
  0x94   :  { %8804 = vmatmul.mubr.msk.f32.vlgmr.msra.gmra.mrb[34].mxu1 %vm216_vm1, %v9668_v18  ;;  %9396 = vmatpush3.bf16.msra.mxu0 %v9395_v50  ;;  %v2673_v18 = vld [vmem:[%s11225_s6 + $0xe0] sm:$0xff] }
  0x95   :  { %9402 = vmatpush3.bf16.msra.mxu1 %v9401_v51  ;;  %9397 = vmatprep.subr.bf16.mxu0 %v9560_v3  ;;  %v9413_v62 = vpack.c.bf16 %v2674_v60, %v2673_v18  ;;  %v2703_v51 = vld [vmem:[%s11225_s6 + $0x1d0] sm:$0xff] }
  0x96   :  { %9403 = vmatprep.subr.bf16.mxu1 %v9560_v3  ;;  %8814 = vmatprep.mubr.msk.f32.mxu0 %vm9561_vm0, %v9562_v11  ;;  %v9458_v55 = vpack.c.bf16 %v2704_v52, %v2703_v51  ;;  %v7931_v51 = vld [vmem:[%s11224_s5 + $0x5] ss:$0 sm:$0xff] }
  0x97   :  { %8825 = vmatprep.mubr.msk.f32.mxu1 %vm9561_vm0, %v9562_v11 }
  0x98   :  { %9399 = vmatpush3.bf16.msra.mxu0 %v9398_v56  ;;  %v9464_v56 = vpack.c.bf16 %v2708_v54, %v2707_v53  ;;  %v7898_v53 = vld [vmem:[%s11222_s3 + $0x4] ss:$0 sm:$0xff] }
  0x99   :  { %9405 = vmatpush3.bf16.msra.mxu1 %v9404_v57  ;;  %9406 = vmatprep.subr.bf16.mxu0 %v9560_v3 }
  0x9a   :  { %9412 = vmatprep.subr.bf16.mxu1 %v9560_v3 }
  0x9b   :  { %8815 = vmatmul.mubr.msk.f32.vlgmr.msra.gmra.mrb[36].mxu0 %vm216_vm1, %v9745_v43 }
  0x9c   :  { %8826 = vmatmul.mubr.msk.f32.vlgmr.msra.gmra.mrb[36].mxu1 %vm216_vm1, %v9745_v43  ;;  %9408 = vmatpush3.bf16.msra.mxu0 %v9407_v61 }
  0x9d   :  { %9414 = vmatpush3.bf16.msra.mxu1 %v9413_v62  ;;  %9409 = vmatprep.subr.bf16.mxu0 %v9560_v3 }
  0x9e   :  { %9415 = vmatprep.subr.bf16.mxu1 %v9560_v3  ;;  %8836 = vmatprep.mubr.msk.f32.mxu0 %vm9561_vm0, %v9562_v11 }
  0x9f   :  { %8847 = vmatprep.mubr.msk.f32.mxu1 %vm9561_vm0, %v9562_v11 }
  0xa0   :  { %9411 = vmatpush3.bf16.msra.mxu0 %v9410_v4 }
  0xa1   :  { %9417 = vmatpush3.bf16.msra.mxu1 %v9416_v6  ;;  %9418 = vmatprep.subr.bf16.mxu0 %v9560_v3 }
  0xa2   :  { %9424 = vmatprep.subr.bf16.mxu1 %v9560_v3 }
  0xa3   :  { %8837 = vmatmul.mubr.msk.f32.vlgmr.msra.gmra.mrb[38].mxu0 %vm216_vm1, %v9745_v43 }
  0xa4   :  { %8848 = vmatmul.mubr.msk.f32.vlgmr.msra.gmra.mrb[38].mxu1 %vm216_vm1, %v9745_v43  ;;  %9420 = vmatpush3.bf16.msra.mxu0 %v9419_v12  ;;  %v2689_v43 = vld [vmem:[%s11225_s6 + $0x160] sm:$0xff] }
  0xa5   :  { %9426 = vmatpush3.bf16.msra.mxu1 %v9425_v13  ;;  %9421 = vmatprep.subr.bf16.mxu0 %v9560_v3  ;;  %v9437_v25 = vpack.c.bf16 %v2690_v23, %v2689_v43 }
  0xa6   :  { %9427 = vmatprep.subr.bf16.mxu1 %v9560_v3  ;;  %8858 = vmatprep.mubr.msk.f32.mxu0 %vm9561_vm0, %v9562_v11 }
  0xa7   :  { %8869 = vmatprep.mubr.msk.f32.mxu1 %vm9561_vm0, %v9562_v11 }
  0xa8   :  { %9423 = vmatpush3.bf16.msra.mxu0 %v9422_v19 }
  0xa9   :  { %9429 = vmatpush3.bf16.msra.mxu1 %v9428_v20  ;;  %9430 = vmatprep.subr.bf16.mxu0 %v9560_v3 }
  0xaa   :  { %9436 = vmatprep.subr.bf16.mxu1 %v9560_v3 }
  0xab   :  { %8859 = vmatmul.mubr.msk.f32.vlgmr.msra.gmra.mrb[40].mxu0 %vm216_vm1, %v9822_v5 }
  0xac   :  { %8870 = vmatmul.mubr.msk.f32.vlgmr.msra.gmra.mrb[40].mxu1 %vm216_vm1, %v9822_v5  ;;  %9432 = vmatpush3.bf16.msra.mxu0 %v9431_v24 }
  0xad   :  { %9438 = vmatpush3.bf16.msra.mxu1 %v9437_v25  ;;  %9433 = vmatprep.subr.bf16.mxu0 %v9560_v3  ;;  %v7926_v25 = vld [vmem:[%s11224_s5] ss:$0 sm:$0xff] }
  0xae   :  { %9439 = vmatprep.subr.bf16.mxu1 %v9560_v3  ;;  %8880 = vmatprep.mubr.msk.f32.mxu0 %vm9561_vm0, %v9562_v11 }
  0xaf   :  { %8891 = vmatprep.mubr.msk.f32.mxu1 %vm9561_vm0, %v9562_v11 }
  0xb0   :  { %9435 = vmatpush3.bf16.msra.mxu0 %v9434_v30 }
  0xb1   :  { %9441 = vmatpush3.bf16.msra.mxu1 %v9440_v31  ;;  %9442 = vmatprep.subr.bf16.mxu0 %v9560_v3 }
  0xb2   :  { %9448 = vmatprep.subr.bf16.mxu1 %v9560_v3 }
  0xb3   :  { %8881 = vmatmul.mubr.msk.f32.vlgmr.msra.gmra.mrb[42].mxu0 %vm216_vm1, %v9822_v5 }
  0xb4   :  { %8892 = vmatmul.mubr.msk.f32.vlgmr.msra.gmra.mrb[42].mxu1 %vm216_vm1, %v9822_v5  ;;  %9444 = vmatpush3.bf16.msra.mxu0 %v9443_v37  ;;  %v2705_v5 = vld [vmem:[%s11225_s6 + $0x1e0] sm:$0xff] }
  0xb5   :  { %9450 = vmatpush3.bf16.msra.mxu1 %v9449_v38  ;;  %9445 = vmatprep.subr.bf16.mxu0 %v9560_v3  ;;  %v9461_v50 = vpack.c.bf16 %v2706_v48, %v2705_v5  ;;  %v7928_v38 = vld [vmem:[%s11224_s5 + $0x2] ss:$0 sm:$0xff] }
  0xb6   :  { %9451 = vmatprep.subr.bf16.mxu1 %v9560_v3  ;;  %8902 = vmatprep.mubr.msk.f32.mxu0 %vm9561_vm0, %v9562_v11 }
  0xb7   :  { %8913 = vmatprep.mubr.msk.f32.mxu1 %vm9561_vm0, %v9562_v11 }
  0xb8   :  { %9447 = vmatpush3.bf16.msra.mxu0 %v9446_v44 }
  0xb9   :  { %9453 = vmatpush3.bf16.msra.mxu1 %v9452_v45  ;;  %9454 = vmatprep.subr.bf16.mxu0 %v9560_v3 }
  0xba   :  { %9460 = vmatprep.subr.bf16.mxu1 %v9560_v3 }
  0xbb   :  { %8903 = vmatmul.mubr.msk.f32.vlgmr.msra.gmra.mrb[44].mxu0 %vm216_vm1, %v9899_v32 }
  0xbc   :  { %8914 = vmatmul.mubr.msk.f32.vlgmr.msra.gmra.mrb[44].mxu1 %vm216_vm1, %v9899_v32  ;;  %9456 = vmatpush3.bf16.msra.mxu0 %v9455_v49 }
  0xbd   :  { %9462 = vmatpush3.bf16.msra.mxu1 %v9461_v50  ;;  %9457 = vmatprep.subr.bf16.mxu0 %v9560_v3  ;;  %v7930_v50 = vld [vmem:[%s11224_s5 + $0x4] ss:$0 sm:$0xff] }
  0xbe   :  { %9463 = vmatprep.subr.bf16.mxu1 %v9560_v3  ;;  %8924 = vmatprep.mubr.msk.f32.mxu0 %vm9561_vm0, %v9562_v11 }
  0xbf   :  { %8935 = vmatprep.mubr.msk.f32.mxu1 %vm9561_vm0, %v9562_v11 }
  0xc0   :  { %9459 = vmatpush3.bf16.msra.mxu0 %v9458_v55 }
  0xc1   :  { %9465 = vmatpush3.bf16.msra.mxu1 %v9464_v56  ;;  %8938 = vmatprep.subr.mxu0 %v9562_v11 }
  0xc2   :  { %8943 = vmatprep.subr.mxu1 %v9562_v11 }
  0xc3   :  { %8925 = vmatmul.mubr.msk.f32.vlgmr.msra.gmra.mrb[46].mxu0 %vm216_vm1, %v9899_v32 }
  0xc4   :  { %8936 = vmatmul.mubr.msk.f32.vlgmr.msra.gmra.mrb[46].mxu1 %vm216_vm1, %v9899_v32  ;;  %8940 = vmatprep.mubr.msk.f32.mxu0 %vm9561_vm0, %v9562_v11 }
  0xc5   :  { %8945 = vmatprep.mubr.msk.f32.mxu1 %vm9561_vm0, %v9562_v11 }
  0xde   :  { %v286_v3 = vpop.f32.mrb[0].mxu0 }
  0xdf   :  { %v8420_v57 = vpop.f32.mrb[1].mxu0  ;;  %v356_v58 = vpop.f32.mrb[0].mxu1  ;;  %v287_v36 = vadd.f32 %v7894_v28, %v286_v3  ;;  %v7899_v3 = vld [vmem:[%s11222_s3 + $0x5] ss:$0 sm:$0xff] }
  0xe0   :  { %v8431_v59 = vpop.f32.mrb[1].mxu1  ;;  %v357_v37 = vadd.f32 %v7895_v33, %v356_v58 }
  0xe6   :  { %v426_v18 = vpop.f32.mrb[2].mxu0 }
  0xe7   :  { %v8442_v60 = vpop.f32.mrb[3].mxu0  ;;  %v496_v61 = vpop.f32.mrb[2].mxu1  ;;  %v427_v48 = vadd.f32 %v7896_v41, %v426_v18  ;;  %v7938_v41 = vld [vmem:[%s11224_s5 + $0xc] ss:$0 sm:$0xff] }
  0xe8   :  { %v8453_v62 = vpop.f32.mrb[3].mxu1  ;;  %v497_v49 = vadd.f32 %v7897_v46, %v496_v61  ;;  %v7932_v60 = vld [vmem:[%s11224_s5 + $0x6] ss:$0 sm:$0xff]  ;;  %v7933_v61 = vld [vmem:[%s11224_s5 + $0x7] ss:$0 sm:$0xff] }
  0xee   :  { %v10511_v63 = vpop.f32.mrb[4].mxu0 }
  0xef   :  { %v8464_v0 = vpop.f32.mrb[5].mxu0  ;;  %v10513_v1 = vpop.f32.mrb[4].mxu1  ;;  %v570_v59 = vadd.f32 %v7898_v53, %v10511_v63  ;;  %v7900_v63 = vld [vmem:[%s11222_s3 + $0x6] ss:$0 sm:$0xff] }
  0xf0   :  { %v8475_v32 = vpop.f32.mrb[5].mxu1  ;;  %v640_v18 = vadd.f32 %v7899_v3, %v10513_v1 }
  0xf6   :  { %v10515_v2 = vpop.f32.mrb[6].mxu0 }
  0xf7   :  { %v8486_v4 = vpop.f32.mrb[7].mxu0  ;;  %v10517_v6 = vpop.f32.mrb[6].mxu1 }
  0xf8   :  { %v8497_v7 = vpop.f32.mrb[7].mxu1  ;;  %v7901_v4 = vld [vmem:[%s11222_s3 + $0x7] ss:$0 sm:$0xff] }
  0xfe   :  { %v10519_v8 = vpop.f32.mrb[8].mxu0 }
  0xff   :  { %v8508_v9 = vpop.f32.mrb[9].mxu0  ;;  %v10521_v10 = vpop.f32.mrb[8].mxu1 }
 0x100   :  { %v8519_v12 = vpop.f32.mrb[9].mxu1 }
 0x101   :  { %v710_v12 = vadd.f32 %v7900_v63, %v10515_v2  ;;  %v7935_v2 = vld [vmem:[%s11224_s5 + $0x9] ss:$0 sm:$0xff] }
 0x106   :  { %v10523_v13 = vpop.f32.mrb[10].mxu0 }
 0x107   :  { %v8530_v14 = vpop.f32.mrb[11].mxu0  ;;  %v10525_v15 = vpop.f32.mrb[10].mxu1 }
 0x108   :  { %v8541_v16 = vpop.f32.mrb[11].mxu1  ;;  %v780_v14 = vadd.f32 %v7901_v4, %v10517_v6  ;;  %v7902_v6 = vld [vmem:[%s11222_s3 + $0x8] ss:$0 sm:$0xff] }
 0x109   :  { %v7934_v16 = vld [vmem:[%s11224_s5 + $0x8] ss:$0 sm:$0xff]  ;;  %v853_v28 = vadd.f32 %v7902_v6, %v10519_v8  ;;  %v7937_v8 = vld [vmem:[%s11224_s5 + $0xb] ss:$0 sm:$0xff] }
 0x10e   :  { %v10527_v17 = vpop.f32.mrb[12].mxu0 }
 0x10f   :  { %v8552_v19 = vpop.f32.mrb[13].mxu0  ;;  %v10529_v20 = vpop.f32.mrb[12].mxu1 }
 0x110   :  { %v8563_v21 = vpop.f32.mrb[13].mxu1 }
 0x116   :  { %v10531_v22 = vpop.f32.mrb[14].mxu0 }
 0x117   :  { %v8574_v43 = vpop.f32.mrb[15].mxu0  ;;  %v10533_v23 = vpop.f32.mrb[14].mxu1 }
 0x118   :  { %v8585_v24 = vpop.f32.mrb[15].mxu1 }
 0x11e   :  { %v1591_v27 = vpop.f32.mrb[16].mxu0 }
 0x11f   :  { %v1592_v29 = vadd.f32 %v7926_v25, %v1591_v27  ;;  %v1661_v30 = vpop.f32.mrb[16].mxu1  ;;  %v8596_v31 = vpop.f32.mrb[17].mxu0  ;;  %v7903_v25 = vld [vmem:[%s11222_s3 + $0x9] ss:$0 sm:$0xff] }
 0x120   :  { %v1662_v34 = vadd.f32 %v7927_v26, %v1661_v30  ;;  %v8607_v35 = vpop.f32.mrb[17].mxu1  ;;  %v7936_v30 = vld [vmem:[%s11224_s5 + $0xa] ss:$0 sm:$0xff] }
 0x121   :  { %8939 = vmatpush3.xpose.msk.msra.mxu0 %vm3941_vm2, %v1592_v29  ;;  %v923_v29 = vadd.f32 %v7903_v25, %v10521_v10  ;;  %v7904_v10 = vld [vmem:[%s11222_s3 + $0xa] ss:$0 sm:$0xff] }
 0x122   :  { %8944 = vmatpush3.xpose.msk.msra.mxu1 %vm3941_vm2, %v1662_v34  ;;  %8948 = vmatprep.subr.mxu0 %v9562_v11 }
 0x123   :  { %8953 = vmatprep.subr.mxu1 %v9562_v11 }
 0x124   :  { %8941 = vmatmul.mubr.msk.f32.vlgmr.msra.gmra.mrb[48].mxu0 %vm3941_vm2, %v287_v36  ;;  %v7905_v36 = vld [vmem:[%s11222_s3 + $0xb] ss:$0 sm:$0xff] }
 0x125   :  { %8946 = vmatmul.mubr.msk.f32.vlgmr.msra.gmra.mrb[48].mxu1 %vm3941_vm2, %v357_v37  ;;  %8950 = vmatprep.mubr.msk.f32.mxu0 %vm9561_vm0, %v9562_v11 }
 0x126   :  { %v1731_v40 = vpop.f32.mrb[18].mxu0  ;;  %8955 = vmatprep.mubr.msk.f32.mxu1 %vm9561_vm0, %v9562_v11 }
 0x127   :  { %v1732_v42 = vadd.f32 %v7928_v38, %v1731_v40  ;;  %v1801_v44 = vpop.f32.mrb[18].mxu1  ;;  %v8618_v45 = vpop.f32.mrb[19].mxu0  ;;  %v1063_v40 = vadd.f32 %v7905_v36, %v10525_v15  ;;  %v7906_v15 = vld [vmem:[%s11222_s3 + $0xc] ss:$0 sm:$0xff] }
 0x128   :  { %v1802_v47 = vadd.f32 %v7929_v39, %v1801_v44  ;;  %v8629_v5 = vpop.f32.mrb[19].mxu1  ;;  %v993_v39 = vadd.f32 %v7904_v10, %v10523_v13  ;;  %v7939_v13 = vld [vmem:[%s11224_s5 + $0xd] ss:$0 sm:$0xff] }
 0x129   :  { %8949 = vmatpush3.xpose.msk.msra.mxu0 %vm3941_vm2, %v1732_v42 }
 0x12a   :  { %8954 = vmatpush3.xpose.msk.msra.mxu1 %vm3941_vm2, %v1802_v47  ;;  %8958 = vmatprep.subr.mxu0 %v9562_v11  ;;  %v7907_v47 = vld [vmem:[%s11222_s3 + $0xd] ss:$0 sm:$0xff] }
 0x12b   :  { %8963 = vmatprep.subr.mxu1 %v9562_v11 }
 0x12c   :  { %8951 = vmatmul.mubr.msk.f32.vlgmr.msra.gmra.mrb[50].mxu0 %vm3941_vm2, %v427_v48 }
 0x12d   :  { %8956 = vmatmul.mubr.msk.f32.vlgmr.msra.gmra.mrb[50].mxu1 %vm3941_vm2, %v497_v49  ;;  %8960 = vmatprep.mubr.msk.f32.mxu0 %vm9561_vm0, %v9562_v11  ;;  %v1136_v49 = vadd.f32 %v7906_v15, %v10527_v17  ;;  %v7941_v17 = vld [vmem:[%s11224_s5 + $0xf] ss:$0 sm:$0xff] }
 0x12e   :  { %v1871_v52 = vpop.f32.mrb[20].mxu0  ;;  %8965 = vmatprep.mubr.msk.f32.mxu1 %vm9561_vm0, %v9562_v11 }
 0x12f   :  { %v1872_v54 = vadd.f32 %v7930_v50, %v1871_v52  ;;  %v1941_v55 = vpop.f32.mrb[20].mxu1  ;;  %v8640_v56 = vpop.f32.mrb[21].mxu0  ;;  %v1206_v50 = vadd.f32 %v7907_v47, %v10529_v20  ;;  %v7908_v20 = vld [vmem:[%s11222_s3 + $0xe] ss:$0 sm:$0xff] }
 0x130   :  { %v1942_v57 = vadd.f32 %v7931_v51, %v1941_v55  ;;  %v8651_v58 = vpop.f32.mrb[21].mxu1  ;;  %v7940_v51 = vld [vmem:[%s11224_s5 + $0xe] ss:$0 sm:$0xff]  ;;  %v7909_v56 = vld [vmem:[%s11222_s3 + $0xf] ss:$0 sm:$0xff] }
 0x131   :  { %8959 = vmatpush3.xpose.msk.msra.mxu0 %vm3941_vm2, %v1872_v54  ;;  %v1276_v58 = vadd.f32 %v7908_v20, %v10531_v22  ;;  %v7959_v22 = vld [vmem:[%s11226_s7 + $0x1] ss:$0 sm:$0xff] }
 0x132   :  { %8964 = vmatpush3.xpose.msk.msra.mxu1 %vm3941_vm2, %v1942_v57  ;;  %8968 = vmatprep.subr.mxu0 %v9562_v11 }
 0x133   :  { %8973 = vmatprep.subr.mxu1 %v9562_v11 }
 0x134   :  { %8961 = vmatmul.mubr.msk.f32.vlgmr.msra.gmra.mrb[52].mxu0 %vm3941_vm2, %v570_v59  ;;  %v1346_v59 = vadd.f32 %v7909_v56, %v10533_v23 }
 0x135   :  { %8966 = vmatmul.mubr.msk.f32.vlgmr.msra.gmra.mrb[52].mxu1 %vm3941_vm2, %v640_v18  ;;  %8970 = vmatprep.mubr.msk.f32.mxu0 %vm9561_vm0, %v9562_v11  ;;  %v7958_v18 = vld [vmem:[%s11226_s7] ss:$0 sm:$0xff] }
 0x136   :  { %v2011_v62 = vpop.f32.mrb[22].mxu0  ;;  %8975 = vmatprep.mubr.msk.f32.mxu1 %vm9561_vm0, %v9562_v11 }
 0x137   :  { %v2012_v0 = vadd.f32 %v7932_v60, %v2011_v62  ;;  %v2081_v1 = vpop.f32.mrb[22].mxu1  ;;  %v8662_v32 = vpop.f32.mrb[23].mxu0 }
 0x138   :  { %v2082_v7 = vadd.f32 %v7933_v61, %v2081_v1  ;;  %v8673_v9 = vpop.f32.mrb[23].mxu1 }
 0x139   :  { %8969 = vmatpush3.xpose.msk.msra.mxu0 %vm3941_vm2, %v2012_v0 }
 0x13a   :  { %8974 = vmatpush3.xpose.msk.msra.mxu1 %vm3941_vm2, %v2082_v7  ;;  %8978 = vmatprep.subr.mxu0 %v9562_v11 }
 0x13b   :  { %8983 = vmatprep.subr.mxu1 %v9562_v11 }
 0x13c   :  { %8971 = vmatmul.mubr.msk.f32.vlgmr.msra.gmra.mrb[54].mxu0 %vm3941_vm2, %v710_v12 }
 0x13d   :  { %8976 = vmatmul.mubr.msk.f32.vlgmr.msra.gmra.mrb[54].mxu1 %vm3941_vm2, %v780_v14  ;;  %8980 = vmatprep.mubr.msk.f32.mxu0 %vm9561_vm0, %v9562_v11 }
 0x13e   :  { %v2151_v19 = vpop.f32.mrb[24].mxu0  ;;  %8985 = vmatprep.mubr.msk.f32.mxu1 %vm9561_vm0, %v9562_v11 }
 0x13f   :  { %v2152_v21 = vadd.f32 %v7934_v16, %v2151_v19  ;;  %v2221_v43 = vpop.f32.mrb[24].mxu1  ;;  %v8684_v24 = vpop.f32.mrb[25].mxu0 }
 0x140   :  { %v2222_v26 = vadd.f32 %v7935_v2, %v2221_v43  ;;  %v8695_v27 = vpop.f32.mrb[25].mxu1 }
 0x141   :  { %8979 = vmatpush3.xpose.msk.msra.mxu0 %vm3941_vm2, %v2152_v21 }
 0x142   :  { %8984 = vmatpush3.xpose.msk.msra.mxu1 %vm3941_vm2, %v2222_v26  ;;  %8988 = vmatprep.subr.mxu0 %v9562_v11 }
 0x143   :  { %8993 = vmatprep.subr.mxu1 %v9562_v11 }
 0x144   :  { %8981 = vmatmul.mubr.msk.f32.vlgmr.msra.gmra.mrb[56].mxu0 %vm3941_vm2, %v853_v28 }
 0x145   :  { %8986 = vmatmul.mubr.msk.f32.vlgmr.msra.gmra.mrb[56].mxu1 %vm3941_vm2, %v923_v29  ;;  %8990 = vmatprep.mubr.msk.f32.mxu0 %vm9561_vm0, %v9562_v11 }
 0x146   :  { %v2291_v31 = vpop.f32.mrb[26].mxu0  ;;  %8995 = vmatprep.mubr.msk.f32.mxu1 %vm9561_vm0, %v9562_v11 }
 0x147   :  { %v2292_v33 = vadd.f32 %v7936_v30, %v2291_v31  ;;  %v2361_v34 = vpop.f32.mrb[26].mxu1  ;;  %v8706_v35 = vpop.f32.mrb[27].mxu0 }
 0x148   :  { %v2362_v37 = vadd.f32 %v7937_v8, %v2361_v34  ;;  %v8717_v38 = vpop.f32.mrb[27].mxu1 }
 0x149   :  { %8989 = vmatpush3.xpose.msk.msra.mxu0 %vm3941_vm2, %v2292_v33 }
 0x14a   :  { %8994 = vmatpush3.xpose.msk.msra.mxu1 %vm3941_vm2, %v2362_v37  ;;  %8998 = vmatprep.subr.mxu0 %v9562_v11 }
 0x14b   :  { %9003 = vmatprep.subr.mxu1 %v9562_v11 }
 0x14c   :  { %8991 = vmatmul.mubr.msk.f32.vlgmr.msra.gmra.mrb[58].mxu0 %vm3941_vm2, %v993_v39  ;;  %v8022_v39 = vld [vmem:[%s11220_s1] ss:$0 sm:$0xff] }
 0x14d   :  { %8996 = vmatmul.mubr.msk.f32.vlgmr.msra.gmra.mrb[58].mxu1 %vm3941_vm2, %v1063_v40  ;;  %9000 = vmatprep.mubr.msk.f32.mxu0 %vm9561_vm0, %v9562_v11 }
 0x14e   :  { %v2431_v42 = vpop.f32.mrb[28].mxu0  ;;  %9005 = vmatprep.mubr.msk.f32.mxu1 %vm9561_vm0, %v9562_v11 }
 0x14f   :  { %v2432_v44 = vadd.f32 %v7938_v41, %v2431_v42  ;;  %v2501_v45 = vpop.f32.mrb[28].mxu1  ;;  %v8728_v46 = vpop.f32.mrb[29].mxu0 }
 0x150   :  { %v2502_v5 = vadd.f32 %v7939_v13, %v2501_v45  ;;  %v8739_v48 = vpop.f32.mrb[29].mxu1 }
 0x151   :  { %8999 = vmatpush3.xpose.msk.msra.mxu0 %vm3941_vm2, %v2432_v44  ;;  %v8023_v44 = vld [vmem:[%s11220_s1 + $0x1] ss:$0 sm:$0xff]  ;;  %v8024_v48 = vld [vmem:[%s11220_s1 + $0x2] ss:$0 sm:$0xff] }
 0x152   :  { %9004 = vmatpush3.xpose.msk.msra.mxu1 %vm3941_vm2, %v2502_v5  ;;  %9008 = vmatprep.subr.mxu0 %v9562_v11 }
 0x153   :  { %9013 = vmatprep.subr.mxu1 %v9562_v11 }
 0x154   :  { %9001 = vmatmul.mubr.msk.f32.vlgmr.msra.gmra.mrb[60].mxu0 %vm3941_vm2, %v1136_v49 }
 0x155   :  { %9006 = vmatmul.mubr.msk.f32.vlgmr.msra.gmra.mrb[60].mxu1 %vm3941_vm2, %v1206_v50  ;;  %9010 = vmatprep.mubr.msk.f32.mxu0 %vm9561_vm0, %v9562_v11 }
 0x156   :  { %v2571_v52 = vpop.f32.mrb[30].mxu0  ;;  %9015 = vmatprep.mubr.msk.f32.mxu1 %vm9561_vm0, %v9562_v11 }
 0x157   :  { %v2572_v53 = vadd.f32 %v7940_v51, %v2571_v52  ;;  %v2641_v54 = vpop.f32.mrb[30].mxu1  ;;  %v8750_v55 = vpop.f32.mrb[31].mxu0 }
 0x158   :  { %v2642_v3 = vadd.f32 %v7941_v17, %v2641_v54  ;;  %v8761_v57 = vpop.f32.mrb[31].mxu1 }
 0x159   :  { %9009 = vmatpush3.xpose.msk.msra.mxu0 %vm3941_vm2, %v2572_v53  ;;  %v8025_v53 = vld [vmem:[%s11220_s1 + $0x3] ss:$0 sm:$0xff]  ;;  %v8027_v57 = vld [vmem:[%s11220_s1 + $0x5] ss:$0 sm:$0xff] }
 0x15a   :  { %9014 = vmatpush3.xpose.msk.msra.mxu1 %vm3941_vm2, %v2642_v3  ;;  %9018 = vmatprep.subr.mxu0 %v9562_v11 }
 0x15b   :  { %9023 = vmatprep.subr.mxu1 %v9562_v11 }
 0x15c   :  { %9011 = vmatmul.mubr.msk.f32.vlgmr.msra.gmra.mrb[62].mxu0 %vm3941_vm2, %v1276_v58  ;;  %v8026_v58 = vld [vmem:[%s11220_s1 + $0x4] ss:$0 sm:$0xff] }
 0x15d   :  { %9016 = vmatmul.mubr.msk.f32.vlgmr.msra.gmra.mrb[62].mxu1 %vm3941_vm2, %v1346_v59  ;;  %9020 = vmatprep.mubr.msk.f32.mxu0 %vm9561_vm0, %v9562_v11 }
 0x15e   :  { %v2887_v60 = vpop.f32.mrb[32].mxu0  ;;  %9025 = vmatprep.mubr.msk.f32.mxu1 %vm9561_vm0, %v9562_v11 }
 0x15f   :  { %v2888_v23 = vadd.f32 %v7958_v18, %v2887_v60  ;;  %v8772_v61 = vpop.f32.mrb[33].mxu0  ;;  %v2957_v62 = vpop.f32.mrb[32].mxu1 }
 0x160   :  { %v2958_v63 = vadd.f32 %v7959_v22, %v2957_v62  ;;  %v8783_v0 = vpop.f32.mrb[33].mxu1 }
 0x161   :  { %9019 = vmatpush3.msra.mxu0 %v2888_v23 }
 0x162   :  { %9024 = vmatpush3.msra.mxu1 %v2958_v63  ;;  %9028 = vmatprep.subr.mxu0 %v9562_v11 }
 0x163   :  { %9033 = vmatprep.subr.mxu1 %v9562_v11 }
 0x166   :  { %v10731_v1 = vpop.f32.mrb[34].mxu0 }
 0x167   :  { %v8794_v32 = vpop.f32.mrb[35].mxu0  ;;  %v10733_v4 = vpop.f32.mrb[34].mxu1 }
 0x168   :  { %v8805_v7 = vpop.f32.mrb[35].mxu1 }
 0x16e   :  { %v10735_v9 = vpop.f32.mrb[36].mxu0 }
 0x16f   :  { %v8816_v12 = vpop.f32.mrb[37].mxu0  ;;  %v10737_v14 = vpop.f32.mrb[36].mxu1 }
 0x170   :  { %v8827_v16 = vpop.f32.mrb[37].mxu1  ;;  %v8028_v12 = vld [vmem:[%s11220_s1 + $0x6] ss:$0 sm:$0xff] }
 0x176   :  { %v10739_v2 = vpop.f32.mrb[38].mxu0 }
 0x177   :  { %v8838_v19 = vpop.f32.mrb[39].mxu0  ;;  %v10741_v6 = vpop.f32.mrb[38].mxu1 }
 0x178   :  { %v8849_v21 = vpop.f32.mrb[39].mxu1 }
 0x17e   :  { %v10743_v43 = vpop.f32.mrb[40].mxu0 }
 0x17f   :  { %v10745_v24 = vpop.f32.mrb[40].mxu1  ;;  %v8860_v25 = vpop.f32.mrb[41].mxu0 }
 0x180   :  { %v8871_v26 = vpop.f32.mrb[41].mxu1  ;;  %v8029_v25 = vld [vmem:[%s11220_s1 + $0x7] ss:$0 sm:$0xff] }
 0x186   :  { %v10747_v27 = vpop.f32.mrb[42].mxu0 }
 0x187   :  { %v10749_v28 = vpop.f32.mrb[42].mxu1  ;;  %v8882_v29 = vpop.f32.mrb[43].mxu0 }
 0x188   :  { %v8893_v30 = vpop.f32.mrb[43].mxu1 }
 0x18e   :  { %v10751_v8 = vpop.f32.mrb[44].mxu0 }
 0x18f   :  { %v10753_v31 = vpop.f32.mrb[44].mxu1  ;;  %v8904_v10 = vpop.f32.mrb[45].mxu0 }
 0x190   :  { %v8915_v33 = vpop.f32.mrb[45].mxu1 }
 0x196   :  { %v10755_v34 = vpop.f32.mrb[46].mxu0 }
 0x197   :  { %v10757_v35 = vpop.f32.mrb[46].mxu1  ;;  %v8926_v36 = vpop.f32.mrb[47].mxu0 }
 0x198   :  { %v8937_v37 = vpop.f32.mrb[47].mxu1 }
 0x1f7   :  { %v4014_v38 = vpop.f32.mrb[48].mxu0 }
 0x1f8   :  { %v5158_v40 = vmul.f32 0.35355338, %v4014_v38  ;;  %v4090_v41 = vpop.f32.mrb[48].mxu1  ;;  %v8942_v13 = vpop.f32.mrb[49].mxu0  ;;  %v8030_v38 = vld [vmem:[%s11220_s1 + $0x8] ss:$0 sm:$0xff] }
 0x1f9   :  { %v5159_v42 = vmul.f32 0.35355338, %v4090_v41  ;;  %v8947_v15 = vpop.f32.mrb[49].mxu1  ;;  %v8031_v13 = vld [vmem:[%s11220_s1 + $0x9] ss:$0 sm:$0xff] }
 0x1fa   :  { %v10765_v45 = vadd.f32 %v8022_v39, %v5158_v40 }
 0x1fb   :  { %v10769_v47 = vadd.f32 %v8023_v44, %v5159_v42 }
 0x1fc   :  { %v5302_v46 = vsel %vm3941_vm2, %v10765_v45, -inf }
 0x1fd   :  { %5303 = vmax.xlane.f32.xlu0 %v5302_v46  ;;  %v5305_v17 = vsel %vm3941_vm2, %v10769_v47, -inf }
 0x1ff   :  { %v4166_v5 = vpop.f32.mrb[50].mxu0 }
 0x200   :  { %v5160_v49 = vmul.f32 0.35355338, %v4166_v5  ;;  %v4242_v50 = vpop.f32.mrb[50].mxu1  ;;  %v8952_v51 = vpop.f32.mrb[51].mxu0 }
 0x201   :  { %v5161_v52 = vmul.f32 0.35355338, %v4242_v50  ;;  %v8957_v20 = vpop.f32.mrb[51].mxu1  ;;  %5306 = vmax.xlane.f32.xlu0 %v5305_v17  ;;  %v8032_v50 = vld [vmem:[%s11220_s1 + $0xa] ss:$0 sm:$0xff] }
 0x202   :  { %v10779_v54 = vadd.f32 %v8024_v48, %v5160_v49  ;;  %v8033_v20 = vld [vmem:[%s11220_s1 + $0xb] ss:$0 sm:$0xff] }
 0x203   :  { %v10783_v56 = vadd.f32 %v8025_v53, %v5161_v52 }
 0x204   :  { %v5308_v55 = vsel %vm3941_vm2, %v10779_v54, -inf }
 0x205   :  { %5309 = vmax.xlane.f32.xlu1 %v5308_v55  ;;  %v5311_v60 = vsel %vm3941_vm2, %v10783_v56, -inf }
 0x207   :  { %v4318_v3 = vpop.f32.mrb[52].mxu0 }
 0x208   :  { %v5162_v59 = vmul.f32 0.35355338, %v4318_v3  ;;  %v4394_v18 = vpop.f32.mrb[52].mxu1  ;;  %v8962_v22 = vpop.f32.mrb[53].mxu0 }
 0x209   :  { %v5163_v23 = vmul.f32 0.35355338, %v4394_v18  ;;  %v8967_v61 = vpop.f32.mrb[53].mxu1  ;;  %5312 = vmax.xlane.f32.xlu1 %v5311_v60  ;;  %v8034_v22 = vld [vmem:[%s11220_s1 + $0xc] ss:$0 sm:$0xff] }
 0x20a   :  { %v10793_v62 = vadd.f32 %v8026_v58, %v5162_v59 }
 0x20b   :  { %v10795_v63 = vadd.f32 %v8027_v57, %v5163_v23 }
 0x20c   :  { %v5314_v0 = vsel %vm3941_vm2, %v10793_v62, -inf }
 0x20d   :  { %v5317_v32 = vsel %vm3941_vm2, %v10795_v63, -inf  ;;  %5315 = vmax.xlane.f32.xlu0 %v5314_v0  ;;  %v8035_v0 = vld [vmem:[%s11220_s1 + $0xd] ss:$0 sm:$0xff] }
 0x20e   :  { %5318 = vmax.xlane.f32.xlu1 %v5317_v32 }
 0x20f   :  { %v4470_v7 = vpop.f32.mrb[54].mxu0 }
 0x210   :  { %v5164_v16 = vmul.f32 0.35355338, %v4470_v7  ;;  %v4546_v19 = vpop.f32.mrb[54].mxu1  ;;  %v8972_v21 = vpop.f32.mrb[55].mxu0 }
 0x211   :  { %v5165_v26 = vmul.f32 0.35355338, %v4546_v19  ;;  %v8977_v29 = vpop.f32.mrb[55].mxu1 }
 0x212   :  { %v10807_v30 = vadd.f32 %v8028_v12, %v5164_v16 }
 0x213   :  { %v10809_v10 = vadd.f32 %v8029_v25, %v5165_v26  ;;  %v8036_v26 = vld [vmem:[%s11220_s1 + $0xe] ss:$0 sm:$0xff] }
 0x214   :  { %v5320_v33 = vsel %vm3941_vm2, %v10807_v30, -inf }
 0x215   :  { %v5323_v36 = vsel %vm3941_vm2, %v10809_v10, -inf  ;;  %5321 = vmax.xlane.f32.xlu0 %v5320_v33 }
 0x216   :  { %5324 = vmax.xlane.f32.xlu1 %v5323_v36 }
 0x217   :  { %v4622_v37 = vpop.f32.mrb[56].mxu0 }
 0x218   :  { %v5166_v39 = vmul.f32 0.35355338, %v4622_v37  ;;  %v4698_v40 = vpop.f32.mrb[56].mxu1  ;;  %v8982_v41 = vpop.f32.mrb[57].mxu0  ;;  %v8037_v37 = vld [vmem:[%s11220_s1 + $0xf] ss:$0 sm:$0xff] }
 0x219   :  { %v5167_v42 = vmul.f32 0.35355338, %v4698_v40  ;;  %v8987_v15 = vpop.f32.mrb[57].mxu1 }
 0x21a   :  { %v10821_v44 = vadd.f32 %v8030_v38, %v5166_v39 }
 0x21b   :  { %v10823_v46 = vadd.f32 %v8031_v13, %v5167_v42 }
 0x21c   :  { %v5326_v5 = vsel %vm3941_vm2, %v10821_v44, -inf }
 0x21d   :  { %v5329_v48 = vsel %vm3941_vm2, %v10823_v46, -inf  ;;  %5327 = vmax.xlane.f32.xlu0 %v5326_v5 }
 0x21e   :  { %5330 = vmax.xlane.f32.xlu1 %v5329_v48 }
 0x21f   :  { %v4774_v49 = vpop.f32.mrb[58].mxu0 }
 0x220   :  { %v5168_v51 = vmul.f32 0.35355338, %v4774_v49  ;;  %v4850_v17 = vpop.f32.mrb[58].mxu1  ;;  %v8992_v52 = vpop.f32.mrb[59].mxu0 }
 0x221   :  { %v5169_v53 = vmul.f32 0.35355338, %v4850_v17  ;;  %v8997_v55 = vpop.f32.mrb[59].mxu1 }
 0x222   :  { %v10835_v3 = vadd.f32 %v8032_v50, %v5168_v51 }
 0x223   :  { %v10837_v57 = vadd.f32 %v8033_v20, %v5169_v53 }
 0x224   :  { %v5332_v58 = vsel %vm3941_vm2, %v10835_v3, -inf }
 0x225   :  { %v5335_v59 = vsel %vm3941_vm2, %v10837_v57, -inf  ;;  %5333 = vmax.xlane.f32.xlu0 %v5332_v58 }
 0x226   :  { %5336 = vmax.xlane.f32.xlu1 %v5335_v59 }
 0x227   :  { %v4926_v18 = vpop.f32.mrb[60].mxu0 }
 0x228   :  { %v5170_v60 = vmul.f32 0.35355338, %v4926_v18  ;;  %v5002_v23 = vpop.f32.mrb[60].mxu1  ;;  %v9002_v61 = vpop.f32.mrb[61].mxu0 }
 0x229   :  { %v5171_v32 = vmul.f32 0.35355338, %v5002_v23  ;;  %v9007_v7 = vpop.f32.mrb[61].mxu1 }
 0x22a   :  { %v10849_v12 = vadd.f32 %v8034_v22, %v5170_v60 }
 0x22b   :  { %v10851_v16 = vadd.f32 %v8035_v0, %v5171_v32 }
 0x22c   :  { %v5338_v19 = vsel %vm3941_vm2, %v10849_v12, -inf }
 0x22d   :  { %v5341_v21 = vsel %vm3941_vm2, %v10851_v16, -inf  ;;  %5339 = vmax.xlane.f32.xlu0 %v5338_v19 }
 0x22e   :  { %5342 = vmax.xlane.f32.xlu1 %v5341_v21 }
 0x22f   :  { %v5078_v25 = vpop.f32.mrb[62].mxu0 }
 0x230   :  { %v5172_v29 = vmul.f32 0.35355338, %v5078_v25  ;;  %v5154_v33 = vpop.f32.mrb[62].mxu1  ;;  %v9012_v36 = vpop.f32.mrb[63].mxu0 }
 0x231   :  { %v5173_v38 = vmul.f32 0.35355338, %v5154_v33  ;;  %v9017_v39 = vpop.f32.mrb[63].mxu1 }
 0x232   :  { %v10863_v40 = vadd.f32 %v8036_v26, %v5172_v29 }
 0x233   :  { %v10865_v41 = vadd.f32 %v8037_v37, %v5173_v38 }
 0x234   :  { %v5344_v13 = vsel %vm3941_vm2, %v10863_v40, -inf }
 0x235   :  { %v5347_v42 = vsel %vm3941_vm2, %v10865_v41, -inf  ;;  %5345 = vmax.xlane.f32.xlu0 %v5344_v13 }
 0x236   :  { %5348 = vmax.xlane.f32.xlu1 %v5347_v42 }
 0x28a   :  { %v5304_v15 = vpop.xlane.xlu0 %5303 }
 0x28b   :  { %v5350_v5 = vsub.f32 %v10765_v45, %v5304_v15 }
 0x28d   :  { %v5366_v48 = vmul.f32 1.442695, %v5350_v5 }
 0x28e   :  { %v5307_v49 = vpop.xlane.xlu0 %5306 }
 0x28f   :  { %9472 = vpow2.f32 %v5366_v48  ;;  %v5351_v50 = vsub.f32 %v10769_v47, %v5307_v49 }
 0x291   :  { %v5368_v51 = vmul.f32 1.442695, %v5351_v50 }
 0x292   :  { %v5310_v17 = vpop.xlane.xlu1 %5309 }
 0x293   :  { %9474 = vpow2.f32 %v5368_v51  ;;  %v5352_v52 = vsub.f32 %v10779_v54, %v5310_v17 }
 0x295   :  { %v5370_v20 = vmul.f32 1.442695, %v5352_v52 }
 0x296   :  { %v5313_v53 = vpop.xlane.xlu1 %5312 }
 0x297   :  { %9476 = vpow2.f32 %v5370_v20  ;;  %v5353_v55 = vsub.f32 %v10783_v56, %v5313_v53 }
 0x299   :  { %v10875_v58 = vpop.eup %9472  ;;  %v5372_v59 = vmul.f32 1.442695, %v5353_v55 }
 0x29a   :  { %v5316_v18 = vpop.xlane.xlu0 %5315  ;;  %v5398_v45 = vsel %vm3941_vm2, %v10875_v58, 0.0 }
 0x29b   :  { %9478 = vpow2.f32 %v5372_v59  ;;  %v5319_v22 = vpop.xlane.xlu1 %5318  ;;  %v5354_v47 = vsub.f32 %v10793_v62, %v5316_v18  ;;  %5399 = vadd.xlane.f32.xlu0 %v5398_v45 }
 0x29c   :  { %v5355_v60 = vsub.f32 %v10795_v63, %v5319_v22 }
 0x29d   :  { %v10881_v54 = vpop.eup %9474  ;;  %v5374_v23 = vmul.f32 1.442695, %v5354_v47 }
 0x29e   :  { %v5376_v61 = vmul.f32 1.442695, %v5355_v60  ;;  %v5401_v56 = vsel %vm3941_vm2, %v10881_v54, 0.0 }
 0x29f   :  { %9480 = vpow2.f32 %v5374_v23  ;;  %5402 = vadd.xlane.f32.xlu1 %v5401_v56 }
 0x2a0   :  { %9482 = vpow2.f32 %v5376_v61 }
 0x2a1   :  { %v10885_v0 = vpop.eup %9476 }
 0x2a2   :  { %v5322_v32 = vpop.xlane.xlu0 %5321  ;;  %v5404_v7 = vsel %vm3941_vm2, %v10885_v0, 0.0 }
 0x2a3   :  { %v5325_v62 = vpop.xlane.xlu1 %5324  ;;  %v5356_v19 = vsub.f32 %v10807_v30, %v5322_v32  ;;  %5405 = vadd.xlane.f32.xlu0 %v5404_v7 }
 0x2a4   :  { %v5357_v63 = vsub.f32 %v10809_v10, %v5325_v62 }
 0x2a5   :  { %v10891_v21 = vpop.eup %9478  ;;  %v5378_v25 = vmul.f32 1.442695, %v5356_v19 }
 0x2a6   :  { %v5380_v26 = vmul.f32 1.442695, %v5357_v63  ;;  %v5407_v29 = vsel %vm3941_vm2, %v10891_v21, 0.0 }
 0x2a7   :  { %9484 = vpow2.f32 %v5378_v25  ;;  %5408 = vadd.xlane.f32.xlu1 %v5407_v29 }
 0x2a8   :  { %9486 = vpow2.f32 %v5380_v26 }
 0x2a9   :  { %v10895_v33 = vpop.eup %9480 }
 0x2aa   :  { %v10897_v36 = vpop.eup %9482  ;;  %v5328_v37 = vpop.xlane.xlu0 %5327  ;;  %v5410_v30 = vsel %vm3941_vm2, %v10895_v33, 0.0 }
 0x2ab   :  { %v5331_v38 = vpop.xlane.xlu1 %5330  ;;  %v5358_v10 = vsub.f32 %v10821_v44, %v5328_v37  ;;  %v5413_v39 = vsel %vm3941_vm2, %v10897_v36, 0.0  ;;  %5411 = vadd.xlane.f32.xlu0 %v5410_v30 }
 0x2ac   :  { %v5359_v13 = vsub.f32 %v10823_v46, %v5331_v38  ;;  %5414 = vadd.xlane.f32.xlu1 %v5413_v39 }
 0x2ad   :  { %v5382_v42 = vmul.f32 1.442695, %v5358_v10 }
 0x2ae   :  { %v5384_v15 = vmul.f32 1.442695, %v5359_v13 }
 0x2af   :  { %9488 = vpow2.f32 %v5382_v42  ;;  %v7960_v42 = vld [vmem:[%s11226_s7 + $0x2] ss:$0 sm:$0xff] }
 0x2b0   :  { %9490 = vpow2.f32 %v5384_v15 }
 0x2b1   :  { %v10905_v5 = vpop.eup %9484 }
 0x2b2   :  { %v10907_v48 = vpop.eup %9486  ;;  %v5334_v49 = vpop.xlane.xlu0 %5333  ;;  %v5416_v50 = vsel %vm3941_vm2, %v10905_v5, 0.0 }
 0x2b3   :  { %v5337_v44 = vpop.xlane.xlu1 %5336  ;;  %v5360_v51 = vsub.f32 %v10835_v3, %v5334_v49  ;;  %v5419_v17 = vsel %vm3941_vm2, %v10907_v48, 0.0  ;;  %5417 = vadd.xlane.f32.xlu0 %v5416_v50 }
 0x2b4   :  { %v5361_v46 = vsub.f32 %v10837_v57, %v5337_v44  ;;  %5420 = vadd.xlane.f32.xlu1 %v5419_v17  ;;  %v3028_v44 = vadd.f32 %v7960_v42, %v10731_v1 }
 0x2b5   :  { %v5386_v52 = vmul.f32 1.442695, %v5360_v51  ;;  %v7961_v51 = vld [vmem:[%s11226_s7 + $0x3] ss:$0 sm:$0xff] }
 0x2b6   :  { %v5388_v20 = vmul.f32 1.442695, %v5361_v46 }
 0x2b7   :  { %9492 = vpow2.f32 %v5386_v52 }
 0x2b8   :  { %9494 = vpow2.f32 %v5388_v20  ;;  %v7962_v20 = vld [vmem:[%s11226_s7 + $0x4] ss:$0 sm:$0xff] }
 0x2b9   :  { %v10915_v53 = vpop.eup %9488 }
 0x2ba   :  { %v10917_v55 = vpop.eup %9490  ;;  %v5340_v59 = vpop.xlane.xlu0 %5339  ;;  %v5422_v18 = vsel %vm3941_vm2, %v10915_v53, 0.0 }
 0x2bb   :  { %v5343_v3 = vpop.xlane.xlu1 %5342  ;;  %v5362_v45 = vsub.f32 %v10849_v12, %v5340_v59  ;;  %v5425_v22 = vsel %vm3941_vm2, %v10917_v55, 0.0  ;;  %5423 = vadd.xlane.f32.xlu0 %v5422_v18  ;;  %v7963_v18 = vld [vmem:[%s11226_s7 + $0x5] ss:$0 sm:$0xff] }
 0x2bc   :  { %v5363_v57 = vsub.f32 %v10851_v16, %v5343_v3  ;;  %5426 = vadd.xlane.f32.xlu1 %v5425_v22 }
 0x2bd   :  { %v5390_v47 = vmul.f32 1.442695, %v5362_v45 }
 0x2be   :  { %v5392_v60 = vmul.f32 1.442695, %v5363_v57 }
 0x2bf   :  { %9496 = vpow2.f32 %v5390_v47 }
 0x2c0   :  { %9498 = vpow2.f32 %v5392_v60  ;;  %v7965_v60 = vld [vmem:[%s11226_s7 + $0x7] ss:$0 sm:$0xff] }
 0x2c1   :  { %v10925_v23 = vpop.eup %9492 }
 0x2c2   :  { %v10927_v61 = vpop.eup %9494  ;;  %v5346_v56 = vpop.xlane.xlu0 %5345  ;;  %v5428_v32 = vsel %vm3941_vm2, %v10925_v23, 0.0 }
 0x2c3   :  { %v5349_v12 = vpop.xlane.xlu1 %5348  ;;  %v5364_v7 = vsub.f32 %v10863_v40, %v5346_v56  ;;  %v5431_v62 = vsel %vm3941_vm2, %v10927_v61, 0.0  ;;  %5429 = vadd.xlane.f32.xlu0 %v5428_v32 }
 0x2c4   :  { %v5365_v16 = vsub.f32 %v10865_v41, %v5349_v12  ;;  %5432 = vadd.xlane.f32.xlu1 %v5431_v62  ;;  %v3378_v12 = vadd.f32 %v7965_v60, %v10741_v6 }
 0x2c5   :  { %v5394_v19 = vmul.f32 1.442695, %v5364_v7 }
 0x2c6   :  { %v5396_v63 = vmul.f32 1.442695, %v5365_v16 }
 0x2c7   :  { %9500 = vpow2.f32 %v5394_v19 }
 0x2c8   :  { %9502 = vpow2.f32 %v5396_v63 }
 0x2c9   :  { %v10935_v25 = vpop.eup %9496 }
 0x2ca   :  { %v10937_v26 = vpop.eup %9498  ;;  %v5434_v29 = vsel %vm3941_vm2, %v10935_v25, 0.0 }
 0x2cb   :  { %v5437_v40 = vsel %vm3941_vm2, %v10937_v26, 0.0  ;;  %5435 = vadd.xlane.f32.xlu0 %v5434_v29 }
 0x2cc   :  { %5438 = vadd.xlane.f32.xlu1 %v5437_v40 }
 0x2d1   :  { %v10943_v37 = vpop.eup %9500 }
 0x2d2   :  { %v10945_v41 = vpop.eup %9502  ;;  %v5440_v30 = vsel %vm3941_vm2, %v10943_v37, 0.0 }
 0x2d3   :  { %v5443_v38 = vsel %vm3941_vm2, %v10945_v41, 0.0  ;;  %5441 = vadd.xlane.f32.xlu0 %v5440_v30 }
 0x2d4   :  { %5444 = vadd.xlane.f32.xlu1 %v5443_v38 }
 0x328   :  { %v5400_v10 = vpop.xlane.xlu0 %5399 }
 0x329   :  { %9504 = vrcp.f32 %v5400_v10 }
 0x32c   :  { %v5403_v39 = vpop.xlane.xlu1 %5402 }
 0x32d   :  { %9506 = vrcp.f32 %v5403_v39 }
 0x330   :  { %v5406_v13 = vpop.xlane.xlu0 %5405 }
 0x331   :  { %9508 = vrcp.f32 %v5406_v13 }
 0x333   :  { %v9505_v15 = vpop.eup %9504 }
 0x334   :  { %v5462_v49 = vmul.f32 %v9505_v15, %v10875_v58  ;;  %v5409_v50 = vpop.xlane.xlu1 %5408  ;;  %v3098_v58 = vadd.f32 %v7961_v51, %v10733_v4  ;;  %v3168_v4 = vadd.f32 %v7962_v20, %v10735_v9  ;;  %v7964_v9 = vld [vmem:[%s11226_s7 + $0x6] ss:$0 sm:$0xff] }
 0x335   :  { %9510 = vrcp.f32 %v5409_v50  ;;  %v3308_v56 = vadd.f32 %v7964_v9, %v10739_v2  ;;  %v7966_v2 = vld [vmem:[%s11226_s7 + $0x8] ss:$0 sm:$0xff] }
 0x336   :  { %9021 = vmatmul.mubr.msk.f32.vlgmr.msra.gmra.mrb[64].mxu0 %vm3941_vm2, %v5462_v49  ;;  %v3448_v19 = vadd.f32 %v7966_v2, %v10743_v43  ;;  %v7968_v43 = vld [vmem:[%s11226_s7 + $0xa] ss:$0 sm:$0xff] }
 0x337   :  { %v9507_v17 = vpop.eup %9506  ;;  %9029 = vmatpush3.msra.mxu0 %v3028_v44  ;;  %9030 = vmatprep.mubr.msk.f32.mxu0 %vm9561_vm0, %v9562_v11  ;;  %v3588_v10 = vadd.f32 %v7968_v43, %v10747_v27  ;;  %v7970_v27 = vld [vmem:[%s11226_s7 + $0xc] ss:$0 sm:$0xff] }
 0x338   :  { %v5463_v46 = vmul.f32 %v9507_v17, %v10881_v54  ;;  %v5412_v52 = vpop.xlane.xlu0 %5411  ;;  %9038 = vmatprep.subr.mxu0 %v9562_v11  ;;  %v3728_v50 = vadd.f32 %v7970_v27, %v10751_v8  ;;  %v7972_v8 = vld [vmem:[%s11226_s7 + $0xe] ss:$0 sm:$0xff] }
 0x339   :  { %v5415_v1 = vpop.xlane.xlu1 %5414  ;;  %9512 = vrcp.f32 %v5412_v52  ;;  %v6651_v9 = vld [vmem:[%s11227_s8 + $0x28] sm:$0xff] }
 0x33a   :  { %9514 = vrcp.f32 %v5415_v1  ;;  %9026 = vmatmul.mubr.msk.f32.vlgmr.msra.gmra.mrb[64].mxu1 %vm3941_vm2, %v5463_v46 }
 0x33b   :  { %v9509_v59 = vpop.eup %9508  ;;  %9034 = vmatpush3.msra.mxu1 %v3098_v58  ;;  %9035 = vmatprep.mubr.msk.f32.mxu1 %vm9561_vm0, %v9562_v11  ;;  %v3868_v58 = vadd.f32 %v7972_v8, %v10755_v34 }
 0x33c   :  { %v5464_v54 = vmul.f32 %v9509_v59, %v10885_v0  ;;  %9043 = vmatprep.subr.mxu1 %v9562_v11  ;;  %v3238_v0 = vadd.f32 %v7963_v18, %v10737_v14  ;;  %v6646_v59 = vld [vmem:[%s11227_s8] sm:$0xff]  ;;  %v6649_v18 = vld [vmem:[%s11227_s8 + $0x18] sm:$0xff] }
 0x33e   :  { %9031 = vmatmul.mubr.msk.f32.vlgmr.msra.gmra.mrb[66].mxu0 %vm3941_vm2, %v5464_v54 }
 0x33f   :  { %v9511_v3 = vpop.eup %9510  ;;  %9039 = vmatpush3.msra.mxu0 %v3168_v4  ;;  %9040 = vmatprep.mubr.msk.f32.mxu0 %vm9561_vm0, %v9562_v11 }
 0x340   :  { %v5465_v45 = vmul.f32 %v9511_v3, %v10891_v21  ;;  %v5418_v22 = vpop.xlane.xlu0 %5417  ;;  %9048 = vmatprep.subr.mxu0 %v9562_v11 }
 0x341   :  { %v5421_v57 = vpop.xlane.xlu1 %5420  ;;  %9516 = vrcp.f32 %v5418_v22  ;;  %v6650_v22 = vld [vmem:[%s11227_s8 + $0x20] sm:$0xff] }
 0x342   :  { %9518 = vrcp.f32 %v5421_v57  ;;  %9036 = vmatmul.mubr.msk.f32.vlgmr.msra.gmra.mrb[66].mxu1 %vm3941_vm2, %v5465_v45 }
 0x343   :  { %v9513_v47 = vpop.eup %9512  ;;  %9044 = vmatpush3.msra.mxu1 %v3238_v0  ;;  %9045 = vmatprep.mubr.msk.f32.mxu1 %vm9561_vm0, %v9562_v11 }
 0x344   :  { %v9515_v21 = vpop.eup %9514  ;;  %v5466_v14 = vmul.f32 %v9513_v47, %v10895_v33  ;;  %9053 = vmatprep.subr.mxu1 %v9562_v11  ;;  %v7967_v33 = vld [vmem:[%s11226_s7 + $0x9] ss:$0 sm:$0xff] }
 0x345   :  { %v5467_v32 = vmul.f32 %v9515_v21, %v10897_v36  ;;  %v3518_v29 = vadd.f32 %v7967_v33, %v10745_v24  ;;  %v6652_v21 = vld [vmem:[%s11227_s8 + $0x30] sm:$0xff] }
 0x346   :  { %9041 = vmatmul.mubr.msk.f32.vlgmr.msra.gmra.mrb[68].mxu0 %vm3941_vm2, %v5466_v14 }
 0x347   :  { %9046 = vmatmul.mubr.msk.f32.vlgmr.msra.gmra.mrb[68].mxu1 %vm3941_vm2, %v5467_v32  ;;  %9049 = vmatpush3.msra.mxu0 %v3308_v56  ;;  %v6653_v56 = vld [vmem:[%s11227_s8 + $0x38] sm:$0xff] }
 0x348   :  { %9054 = vmatpush3.msra.mxu1 %v3378_v12  ;;  %v5424_v7 = vpop.xlane.xlu0 %5423  ;;  %9050 = vmatprep.mubr.msk.f32.mxu0 %vm9561_vm0, %v9562_v11 }
 0x349   :  { %v5427_v62 = vpop.xlane.xlu1 %5426  ;;  %9520 = vrcp.f32 %v5424_v7  ;;  %9055 = vmatprep.mubr.msk.f32.mxu1 %vm9561_vm0, %v9562_v11  ;;  %9058 = vmatprep.subr.mxu0 %v9562_v11 }
 0x34a   :  { %9522 = vrcp.f32 %v5427_v62  ;;  %9063 = vmatprep.subr.mxu1 %v9562_v11  ;;  %v6654_v62 = vld [vmem:[%s11227_s8 + $0x40] sm:$0xff] }
 0x34b   :  { %v9517_v6 = vpop.eup %9516 }
 0x34c   :  { %v9519_v36 = vpop.eup %9518  ;;  %v5468_v16 = vmul.f32 %v9517_v6, %v10905_v5  ;;  %v7969_v5 = vld [vmem:[%s11226_s7 + $0xb] ss:$0 sm:$0xff] }
 0x34d   :  { %v5469_v63 = vmul.f32 %v9519_v36, %v10907_v48  ;;  %v3658_v13 = vadd.f32 %v7969_v5, %v10749_v28  ;;  %v6655_v6 = vld [vmem:[%s11227_s8 + $0x48] sm:$0xff] }
 0x34e   :  { %9051 = vmatmul.mubr.msk.f32.vlgmr.msra.gmra.mrb[70].mxu0 %vm3941_vm2, %v5468_v16 }
 0x34f   :  { %9056 = vmatmul.mubr.msk.f32.vlgmr.msra.gmra.mrb[70].mxu1 %vm3941_vm2, %v5469_v63  ;;  %9059 = vmatpush3.msra.mxu0 %v3448_v19  ;;  %v6656_v19 = vld [vmem:[%s11227_s8 + $0x50] sm:$0xff] }
 0x350   :  { %9064 = vmatpush3.msra.mxu1 %v3518_v29  ;;  %v5430_v40 = vpop.xlane.xlu0 %5429  ;;  %9060 = vmatprep.mubr.msk.f32.mxu0 %vm9561_vm0, %v9562_v11  ;;  %v6657_v29 = vld [vmem:[%s11227_s8 + $0x58] sm:$0xff] }
 0x351   :  { %v5433_v30 = vpop.xlane.xlu1 %5432  ;;  %9524 = vrcp.f32 %v5430_v40  ;;  %9065 = vmatprep.mubr.msk.f32.mxu1 %vm9561_vm0, %v9562_v11  ;;  %9068 = vmatprep.subr.mxu0 %v9562_v11 }
 0x352   :  { %9526 = vrcp.f32 %v5433_v30  ;;  %9073 = vmatprep.subr.mxu1 %v9562_v11 }
 0x353   :  { %v9521_v24 = vpop.eup %9520 }
 0x354   :  { %v9523_v48 = vpop.eup %9522  ;;  %v5470_v38 = vmul.f32 %v9521_v24, %v10915_v53  ;;  %v7971_v53 = vld [vmem:[%s11226_s7 + $0xd] ss:$0 sm:$0xff]  ;;  %v6658_v24 = vld [vmem:[%s11227_s8 + $0x60] sm:$0xff] }
 0x355   :  { %v5471_v39 = vmul.f32 %v9523_v48, %v10917_v55  ;;  %v3798_v51 = vadd.f32 %v7971_v53, %v10753_v31  ;;  %v6659_v48 = vld [vmem:[%s11227_s8 + $0x68] sm:$0xff] }
 0x356   :  { %9061 = vmatmul.mubr.msk.f32.vlgmr.msra.gmra.mrb[72].mxu0 %vm3941_vm2, %v5470_v38 }
 0x357   :  { %9066 = vmatmul.mubr.msk.f32.vlgmr.msra.gmra.mrb[72].mxu1 %vm3941_vm2, %v5471_v39  ;;  %9069 = vmatpush3.msra.mxu0 %v3588_v10 }
 0x358   :  { %9074 = vmatpush3.msra.mxu1 %v3658_v13  ;;  %v5436_v42 = vpop.xlane.xlu0 %5435  ;;  %9070 = vmatprep.mubr.msk.f32.mxu0 %vm9561_vm0, %v9562_v11  ;;  %v6660_v13 = vld [vmem:[%s11227_s8 + $0x70] sm:$0xff] }
 0x359   :  { %v5439_v15 = vpop.xlane.xlu1 %5438  ;;  %9528 = vrcp.f32 %v5436_v42  ;;  %9075 = vmatprep.mubr.msk.f32.mxu1 %vm9561_vm0, %v9562_v11  ;;  %9078 = vmatprep.subr.mxu0 %v9562_v11 }
 0x35a   :  { %9530 = vrcp.f32 %v5439_v15  ;;  %9083 = vmatprep.subr.mxu1 %v9562_v11  ;;  %v6661_v15 = vld [vmem:[%s11227_s8 + $0x78] sm:$0xff] }
 0x35b   :  { %v9525_v28 = vpop.eup %9524 }
 0x35c   :  { %v9527_v55 = vpop.eup %9526  ;;  %v5472_v49 = vmul.f32 %v9525_v28, %v10925_v23  ;;  %v7973_v23 = vld [vmem:[%s11226_s7 + $0xf] ss:$0 sm:$0xff] }
 0x35d   :  { %v5473_v44 = vmul.f32 %v9527_v55, %v10927_v61  ;;  %v3938_v20 = vadd.f32 %v7973_v23, %v10757_v35 }
 0x35e   :  { %9071 = vmatmul.mubr.msk.f32.vlgmr.msra.gmra.mrb[74].mxu0 %vm3941_vm2, %v5472_v49 }
 0x35f   :  { %9076 = vmatmul.mubr.msk.f32.vlgmr.msra.gmra.mrb[74].mxu1 %vm3941_vm2, %v5473_v44  ;;  %9079 = vmatpush3.msra.mxu0 %v3728_v50 }
 0x360   :  { %9084 = vmatpush3.msra.mxu1 %v3798_v51  ;;  %v5442_v17 = vpop.xlane.xlu0 %5441  ;;  %9080 = vmatprep.mubr.msk.f32.mxu0 %vm9561_vm0, %v9562_v11 }
 0x361   :  { %v5445_v46 = vpop.xlane.xlu1 %5444  ;;  %9532 = vrcp.f32 %v5442_v17  ;;  %9085 = vmatprep.mubr.msk.f32.mxu1 %vm9561_vm0, %v9562_v11  ;;  %9088 = vmatprep.subr.mxu0 %v9562_v11 }
 0x362   :  { %9534 = vrcp.f32 %v5445_v46  ;;  %9093 = vmatprep.subr.mxu1 %v9562_v11 }
 0x363   :  { %v9529_v31 = vpop.eup %9528 }
 0x364   :  { %v9531_v61 = vpop.eup %9530  ;;  %v5474_v52 = vmul.f32 %v9529_v31, %v10935_v25 }
 0x365   :  { %v5475_v1 = vmul.f32 %v9531_v61, %v10937_v26 }
 0x366   :  { %9081 = vmatmul.mubr.msk.f32.vlgmr.msra.gmra.mrb[76].mxu0 %vm3941_vm2, %v5474_v52 }
 0x367   :  { %9086 = vmatmul.mubr.msk.f32.vlgmr.msra.gmra.mrb[76].mxu1 %vm3941_vm2, %v5475_v1  ;;  %9089 = vmatpush3.msra.mxu0 %v3868_v58 }
 0x368   :  { %9094 = vmatpush3.msra.mxu1 %v3938_v20  ;;  %9090 = vmatprep.mubr.msk.f32.mxu0 %vm9561_vm0, %v9562_v11 }
 0x369   :  { %9095 = vmatprep.mubr.msk.f32.mxu1 %vm9561_vm0, %v9562_v11  ;;  %9098 = vmatprep.subr.mxu0 %v9562_v11 }
 0x36a   :  { %9103 = vmatprep.subr.mxu1 %v9562_v11 }
 0x36b   :  { %v9533_v34 = vpop.eup %9532 }
 0x36c   :  { %v9535_v25 = vpop.eup %9534  ;;  %v5476_v35 = vmul.f32 %v9533_v34, %v10943_v37  ;;  %v6647_v37 = vld [vmem:[%s11227_s8 + $0x8] sm:$0xff] }
 0x36d   :  { %v5477_v26 = vmul.f32 %v9535_v25, %v10945_v41  ;;  %v6648_v41 = vld [vmem:[%s11227_s8 + $0x10] sm:$0xff] }
 0x36e   :  { %9091 = vmatmul.mubr.msk.f32.vlgmr.msra.gmra.mrb[78].mxu0 %vm3941_vm2, %v5476_v35 }
 0x36f   :  { %9096 = vmatmul.mubr.msk.f32.vlgmr.msra.gmra.mrb[78].mxu1 %vm3941_vm2, %v5477_v26  ;;  %9100 = vmatprep.mubr.msk.f32.mxu0 %vm9561_vm0, %v9562_v11 }
 0x370   :  { %9105 = vmatprep.mubr.msk.f32.mxu1 %vm9561_vm0, %v9562_v11  ;;  %9099 = vmatpush3.msra.mxu0 %v6646_v59 }
 0x371   :  { %9108 = vmatprep.subr.mxu0 %v9562_v11  ;;  %9104 = vmatpush3.msra.mxu1 %v6647_v37 }
 0x372   :  { %9113 = vmatprep.subr.mxu1 %v9562_v11 }
 0x409   :  { %v5547_v54 = vpop.f32.mrb[64].mxu0 }
 0x40a   :  { %v9022_v4 = vpop.f32.mrb[65].mxu0  ;;  %9101 = vmatmul.mubr.msk.f32.vlgmr.msra.gmra.mrb[80].mxu0 %vm3941_vm2, %v5547_v54 }
 0x40b   :  { %9109 = vmatpush3.msra.mxu0 %v6648_v41  ;;  %9110 = vmatprep.mubr.msk.f32.mxu0 %vm9561_vm0, %v9562_v11 }
 0x40c   :  { %9118 = vmatprep.subr.mxu0 %v9562_v11 }
 0x40d   :  { %v5620_v3 = vpop.f32.mrb[64].mxu1 }
 0x40e   :  { %v9027_v45 = vpop.f32.mrb[65].mxu1  ;;  %9106 = vmatmul.mubr.msk.f32.vlgmr.msra.gmra.mrb[80].mxu1 %vm3941_vm2, %v5620_v3  ;;  %v8071_v3 = vld [vmem:[%s11228_s9 + $0x1] ss:$0 sm:$0xff] }
 0x40f   :  { %9114 = vmatpush3.msra.mxu1 %v6649_v18  ;;  %9115 = vmatprep.mubr.msk.f32.mxu1 %vm9561_vm0, %v9562_v11 }
 0x410   :  { %9123 = vmatprep.subr.mxu1 %v9562_v11 }
 0x411   :  { %v5693_v0 = vpop.f32.mrb[66].mxu0 }
 0x412   :  { %v9032_v57 = vpop.f32.mrb[67].mxu0  ;;  %9111 = vmatmul.mubr.msk.f32.vlgmr.msra.gmra.mrb[82].mxu0 %vm3941_vm2, %v5693_v0 }
 0x413   :  { %9119 = vmatpush3.msra.mxu0 %v6650_v22  ;;  %9120 = vmatprep.mubr.msk.f32.mxu0 %vm9561_vm0, %v9562_v11 }
 0x414   :  { %9128 = vmatprep.subr.mxu0 %v9562_v11 }
 0x415   :  { %v5766_v47 = vpop.f32.mrb[66].mxu1 }
 0x416   :  { %v9037_v60 = vpop.f32.mrb[67].mxu1  ;;  %9116 = vmatmul.mubr.msk.f32.vlgmr.msra.gmra.mrb[82].mxu1 %vm3941_vm2, %v5766_v47 }
 0x417   :  { %9124 = vmatpush3.msra.mxu1 %v6651_v9  ;;  %9125 = vmatprep.mubr.msk.f32.mxu1 %vm9561_vm0, %v9562_v11 }
 0x418   :  { %9133 = vmatprep.subr.mxu1 %v9562_v11 }
 0x419   :  { %v5839_v14 = vpop.f32.mrb[68].mxu0 }
 0x41a   :  { %v5912_v32 = vpop.f32.mrb[68].mxu1  ;;  %v9042_v12 = vpop.f32.mrb[69].mxu0  ;;  %9121 = vmatmul.mubr.msk.f32.vlgmr.msra.gmra.mrb[84].mxu0 %vm3941_vm2, %v5839_v14 }
 0x41b   :  { %v9047_v7 = vpop.f32.mrb[69].mxu1  ;;  %9126 = vmatmul.mubr.msk.f32.vlgmr.msra.gmra.mrb[84].mxu1 %vm3941_vm2, %v5912_v32  ;;  %9129 = vmatpush3.msra.mxu0 %v6652_v21 }
 0x41c   :  { %9130 = vmatprep.mubr.msk.f32.mxu0 %vm9561_vm0, %v9562_v11  ;;  %9134 = vmatpush3.msra.mxu1 %v6653_v56  ;;  %v8072_v7 = vld [vmem:[%s11228_s9 + $0x2] ss:$0 sm:$0xff] }
 0x41d   :  { %9135 = vmatprep.mubr.msk.f32.mxu1 %vm9561_vm0, %v9562_v11  ;;  %9138 = vmatprep.subr.mxu0 %v9562_v11 }
 0x41e   :  { %9143 = vmatprep.subr.mxu1 %v9562_v11 }
 0x421   :  { %v5985_v2 = vpop.f32.mrb[70].mxu0 }
 0x422   :  { %v6058_v33 = vpop.f32.mrb[70].mxu1  ;;  %v9052_v36 = vpop.f32.mrb[71].mxu0  ;;  %9131 = vmatmul.mubr.msk.f32.vlgmr.msra.gmra.mrb[86].mxu0 %vm3941_vm2, %v5985_v2 }
 0x423   :  { %v9057_v16 = vpop.f32.mrb[71].mxu1  ;;  %9136 = vmatmul.mubr.msk.f32.vlgmr.msra.gmra.mrb[86].mxu1 %vm3941_vm2, %v6058_v33  ;;  %9139 = vmatpush3.msra.mxu0 %v6654_v62 }
 0x424   :  { %9140 = vmatprep.mubr.msk.f32.mxu0 %vm9561_vm0, %v9562_v11  ;;  %9144 = vmatpush3.msra.mxu1 %v6655_v6 }
 0x425   :  { %9145 = vmatprep.mubr.msk.f32.mxu1 %vm9561_vm0, %v9562_v11  ;;  %9148 = vmatprep.subr.mxu0 %v9562_v11 }
 0x426   :  { %9153 = vmatprep.subr.mxu1 %v9562_v11 }
 0x429   :  { %v6131_v63 = vpop.f32.mrb[72].mxu0 }
 0x42a   :  { %v6204_v40 = vpop.f32.mrb[72].mxu1  ;;  %v9062_v30 = vpop.f32.mrb[73].mxu0  ;;  %9141 = vmatmul.mubr.msk.f32.vlgmr.msra.gmra.mrb[88].mxu0 %vm3941_vm2, %v6131_v63 }
 0x42b   :  { %v9067_v43 = vpop.f32.mrb[73].mxu1  ;;  %9146 = vmatmul.mubr.msk.f32.vlgmr.msra.gmra.mrb[88].mxu1 %vm3941_vm2, %v6204_v40  ;;  %9149 = vmatpush3.msra.mxu0 %v6656_v19 }
 0x42c   :  { %9150 = vmatprep.mubr.msk.f32.mxu0 %vm9561_vm0, %v9562_v11  ;;  %9154 = vmatpush3.msra.mxu1 %v6657_v29 }
 0x42d   :  { %9155 = vmatprep.mubr.msk.f32.mxu1 %vm9561_vm0, %v9562_v11  ;;  %9158 = vmatprep.subr.mxu0 %v9562_v11 }
 0x42e   :  { %9163 = vmatprep.subr.mxu1 %v9562_v11 }
 0x431   :  { %v6277_v5 = vpop.f32.mrb[74].mxu0 }
 0x432   :  { %v6350_v38 = vpop.f32.mrb[74].mxu1  ;;  %v9072_v10 = vpop.f32.mrb[75].mxu0  ;;  %9151 = vmatmul.mubr.msk.f32.vlgmr.msra.gmra.mrb[90].mxu0 %vm3941_vm2, %v6277_v5 }
 0x433   :  { %v9077_v39 = vpop.f32.mrb[75].mxu1  ;;  %9156 = vmatmul.mubr.msk.f32.vlgmr.msra.gmra.mrb[90].mxu1 %vm3941_vm2, %v6350_v38  ;;  %9159 = vmatpush3.msra.mxu0 %v6658_v24  ;;  %v8073_v24 = vld [vmem:[%s11228_s9 + $0x3] ss:$0 sm:$0xff] }
 0x434   :  { %9160 = vmatprep.mubr.msk.f32.mxu0 %vm9561_vm0, %v9562_v11  ;;  %9164 = vmatpush3.msra.mxu1 %v6659_v48 }
 0x435   :  { %9165 = vmatprep.mubr.msk.f32.mxu1 %vm9561_vm0, %v9562_v11  ;;  %9168 = vmatprep.subr.mxu0 %v9562_v11 }
 0x436   :  { %9173 = vmatprep.subr.mxu1 %v9562_v11 }
 0x439   :  { %v6423_v42 = vpop.f32.mrb[76].mxu0 }
 0x43a   :  { %v6496_v27 = vpop.f32.mrb[76].mxu1  ;;  %v9082_v28 = vpop.f32.mrb[77].mxu0  ;;  %9161 = vmatmul.mubr.msk.f32.vlgmr.msra.gmra.mrb[92].mxu0 %vm3941_vm2, %v6423_v42 }
 0x43b   :  { %v9087_v53 = vpop.f32.mrb[77].mxu1  ;;  %9166 = vmatmul.mubr.msk.f32.vlgmr.msra.gmra.mrb[92].mxu1 %vm3941_vm2, %v6496_v27  ;;  %9169 = vmatpush3.msra.mxu0 %v6660_v13 }
 0x43c   :  { %9170 = vmatprep.mubr.msk.f32.mxu0 %vm9561_vm0, %v9562_v11  ;;  %9174 = vmatpush3.msra.mxu1 %v6661_v15 }
 0x43d   :  { %9175 = vmatprep.mubr.msk.f32.mxu1 %vm9561_vm0, %v9562_v11  ;;  %v8070_v11 = vld [vmem:[%s11228_s9] ss:$0 sm:$0xff] }
 0x441   :  { %v6569_v55 = vpop.f32.mrb[78].mxu0 }
 0x442   :  { %v6642_v49 = vpop.f32.mrb[78].mxu1  ;;  %v9092_v50 = vpop.f32.mrb[79].mxu0  ;;  %9171 = vmatmul.mubr.msk.f32.vlgmr.msra.gmra.mrb[94].mxu0 %vm3941_vm2, %v6569_v55 }
 0x443   :  { %v9097_v44 = vpop.f32.mrb[79].mxu1  ;;  %9176 = vmatmul.mubr.msk.f32.vlgmr.msra.gmra.mrb[94].mxu1 %vm3941_vm2, %v6642_v49 }
 0x4dd   :  { %v6731_v51 = vpop.f32.mrb[80].mxu0 }
 0x4de   :  { %v9102_v17 = vpop.f32.mrb[81].mxu0 }
 0x4e1   :  { %v6804_v46 = vpop.f32.mrb[80].mxu1 }
 0x4e2   :  { %v7830_v8 = vadd.f32 %v6804_v46, %v6731_v51  ;;  %v9107_v31 = vpop.f32.mrb[81].mxu1 }
 0x4e5   :  { %v6877_v23 = vpop.f32.mrb[82].mxu0 }
 0x4e6   :  { %v7834_v61 = vadd.f32 %v7830_v8, %v6877_v23  ;;  %v9112_v52 = vpop.f32.mrb[83].mxu0 }
 0x4e9   :  { %v6950_v58 = vpop.f32.mrb[82].mxu1 }
 0x4ea   :  { %v7838_v1 = vadd.f32 %v7834_v61, %v6950_v58  ;;  %v9117_v20 = vpop.f32.mrb[83].mxu1 }
 0x4ec   :  { %v7870_v34 = vadd.f32 %v8070_v11, %v7838_v1 }
 0x4ed   :  { %v7023_v25 = vpop.f32.mrb[84].mxu0 }
 0x4ee   :  { %7874 = vst.msk [vmem:[#allocation2] sm:$0xff] %vm216_vm1, %v7870_v34  ;;  %v7096_v35 = vpop.f32.mrb[84].mxu1  ;;  %v9122_v26 = vpop.f32.mrb[85].mxu0 }
 0x4ef   :  { %v7831_v59 = vadd.f32 %v7096_v35, %v7023_v25  ;;  %v9127_v37 = vpop.f32.mrb[85].mxu1 }
 0x4f5   :  { %v7169_v41 = vpop.f32.mrb[86].mxu0 }
 0x4f6   :  { %v7835_v54 = vadd.f32 %v7831_v59, %v7169_v41  ;;  %v7242_v4 = vpop.f32.mrb[86].mxu1  ;;  %v9132_v18 = vpop.f32.mrb[87].mxu0 }
 0x4f7   :  { %v9137_v45 = vpop.f32.mrb[87].mxu1 }
 0x4f8   :  { %v7839_v22 = vadd.f32 %v7835_v54, %v7242_v4 }
 0x4fa   :  { %v7871_v0 = vadd.f32 %v8071_v3, %v7839_v22 }
 0x4fc   :  { %7875 = vst.msk [vmem:[#allocation2 + $0x8] sm:$0xff] %vm216_vm1, %v7871_v0 }
 0x4fd   :  { %v7315_v57 = vpop.f32.mrb[88].mxu0 }
 0x4fe   :  { %v7388_v9 = vpop.f32.mrb[88].mxu1  ;;  %v9142_v47 = vpop.f32.mrb[89].mxu0 }
 0x4ff   :  { %v7832_v60 = vadd.f32 %v7388_v9, %v7315_v57  ;;  %v9147_v21 = vpop.f32.mrb[89].mxu1 }
 0x505   :  { %v7461_v14 = vpop.f32.mrb[90].mxu0 }
 0x506   :  { %v7836_v56 = vadd.f32 %v7832_v60, %v7461_v14  ;;  %v7534_v32 = vpop.f32.mrb[90].mxu1  ;;  %v9152_v12 = vpop.f32.mrb[91].mxu0 }
 0x507   :  { %v9157_v62 = vpop.f32.mrb[91].mxu1 }
 0x508   :  { %v7840_v2 = vadd.f32 %v7836_v56, %v7534_v32 }
 0x50a   :  { %v7872_v6 = vadd.f32 %v8072_v7, %v7840_v2 }
 0x50c   :  { %7876 = vst.msk [vmem:[#allocation2 + $0x10] sm:$0xff] %vm216_vm1, %v7872_v6 }
 0x50d   :  { %v7607_v33 = vpop.f32.mrb[92].mxu0 }
 0x50e   :  { %v7680_v36 = vpop.f32.mrb[92].mxu1  ;;  %v9162_v16 = vpop.f32.mrb[93].mxu0 }
 0x50f   :  { %v7833_v19 = vadd.f32 %v7680_v36, %v7607_v33  ;;  %v9167_v63 = vpop.f32.mrb[93].mxu1 }
 0x515   :  { %v7753_v29 = vpop.f32.mrb[94].mxu0 }
 0x516   :  { %v7837_v40 = vadd.f32 %v7833_v19, %v7753_v29  ;;  %v7826_v30 = vpop.f32.mrb[94].mxu1  ;;  %v9172_v43 = vpop.f32.mrb[95].mxu0 }
 0x517   :  { %v9177_v5 = vpop.f32.mrb[95].mxu1 }
 0x518   :  { %v7841_v48 = vadd.f32 %v7837_v40, %v7826_v30 }
 0x51a   :  { %v7873_v38 = vadd.f32 %v8073_v24, %v7841_v48 }
 0x51c   :  { %7877 = vst.msk [vmem:[#allocation2 + $0x18] sm:$0xff] %vm216_vm1, %v7873_v38 }
 0x51d   :  { %9547 = shalt.err (!%p9544_p4)
}
 0x51e   :  { %s9548_s4 = scalar_lea.hbm %s11229_s10, 512 }
 0x51f   :  { %p9549_p5 = scmp.ne.s32.totalorder %s11229_s10, %s9548_s4  ;;  %p9552_p6 = scmp.lt.u32.totalorder %s9548_s4, %s11229_s10 }
 0x521   :  { %p9554_p7 = pnand %p9552_p6, %p9549_p5 }
 0x523   :  { %9557 = shalt.err (!%p9554_p7)
}
 0x524   :  { %s9564_s29 = smov 128   ;;  %s9565_s30 = smov 8  }
 0x525   :  { %7889 = dma.vmem_to_hbm [thread:$0]  %s7884_s25, 512, %s11229_s10, [#allocation3], %s9564_s29, %s9564_s29, %s9565_s30  }
 0x526   :  { %9558 = dma.done.wait [#allocation3], 512  }
 0x527   :  { %9559 = vsyncadd [#allocation3], 4294966784 }
 0x528   :  { %7893 = vsyncpa [#allocation3], 1 }

</bundles_post_ra>
